<compile_context>
chip_gen: v7x
topology: tpu7x:2x2x1
jax: 0.10.0
libtpu: 0.0.40
codegen_flags: <defaults>
</compile_context>

<pallas_src>
import jax
import jax.numpy as jnp
from jax.experimental import pallas as pl
from jax.experimental.pallas import tpu as pltpu


# ---------------------------------------------------------------------------
# Fused Pallas kernel
# ---------------------------------------------------------------------------

def _make_fused_kernel(num_layers, T, Bp, H):
    """Build the fused forward kernel (closure over static sizes).

    Ref order (inputs, outputs, scratch):
      x_ref                      : (T*Bp, Din)   time-major, batch-padded input
      per layer l:  wih_ref      : (Din_l, 4H)   W_ih^T  (PyTorch gate order i,f,g,o)
                    whh_ref      : (H, 4H)       W_hh^T
                    b_ref        : (1, 4H)       b_ih + b_hh
      w1_ref (H,F), b1_ref (1,F), w2_ref (F,O), b2_ref (1,O)
      out_ref                    : (Bp, O)       softmax probabilities
      seq_scr                    : (T*Bp, H) VMEM  inter-layer hidden sequence
    """

    def kernel(*refs):
        n_in = 1 + 3 * num_layers + 4
        x_ref = refs[0]
        lstm_refs = refs[1:1 + 3 * num_layers]
        w1_ref, b1_ref, w2_ref, b2_ref = refs[1 + 3 * num_layers:n_in]
        out_ref = refs[n_in]
        seq_scr = refs[n_in + 1]

        h = None
        for l in range(num_layers):
            wih = lstm_refs[3 * l][...]        # (Din_l, 4H)
            whh = lstm_refs[3 * l + 1][...]    # (H, 4H)
            bias = lstm_refs[3 * l + 2][...]   # (1, 4H)

            # Layer input: raw x for layer 0, previous layer's hidden sequence
            # (kept entirely in VMEM scratch) otherwise.
            inp2d = x_ref[...] if l == 0 else seq_scr[...]

            # Hoist the input projection out of the recurrence: one MXU matmul
            # covering all T timesteps.  Only h @ W_hh^T stays in the loop.
            gx = jnp.dot(inp2d, wih, preferred_element_type=jnp.float32) + bias

            write_seq = l < num_layers - 1  # last layer: only final h needed

            h = jnp.zeros((Bp, H), jnp.float32)
            c = jnp.zeros((Bp, H), jnp.float32)
            for t in range(T):                 # static unroll, static offsets
                row = t * Bp                   # sublane-aligned (Bp % 8 == 0)
                gates = gx[row:row + Bp, :] + jnp.dot(
                    h, whh, preferred_element_type=jnp.float32)   # (Bp, 4H)
                # Two full-vreg EUP passes instead of four partial ones.
                sig = jax.nn.sigmoid(gates)
                tah = jnp.tanh(gates)
                i_g = sig[:, 0 * H:1 * H]
                f_g = sig[:, 1 * H:2 * H]
                g_g = tah[:, 2 * H:3 * H]
                o_g = sig[:, 3 * H:4 * H]
                c = f_g * c + i_g * g_g
                h = o_g * jnp.tanh(c)
                if write_seq:
                    seq_scr[row:row + Bp, :] = h

        # Head: fc1 -> relu -> fc2 -> softmax(dim=1), fused in the same kernel.
        z1 = jnp.dot(h, w1_ref[...],
                     preferred_element_type=jnp.float32) + b1_ref[...]
        a1 = jnp.maximum(z1, 0.0)
        z2 = jnp.dot(a1, w2_ref[...],
                     preferred_element_type=jnp.float32) + b2_ref[...]
        z2 = z2 - jnp.max(z2, axis=-1, keepdims=True)
        e = jnp.exp(z2)
        out_ref[...] = (e / jnp.sum(e, axis=-1, keepdims=True)).astype(out_ref.dtype)

    return kernel


# ---------------------------------------------------------------------------
# Wrapper
# ---------------------------------------------------------------------------

@jax.jit
def lstm_model_forward(params, x_btd):
    """Forward pass matching LSTMModel.forward.

    x_btd : (B, T, input_dim) batch-first, like PyTorch nn.LSTM(batch_first=True).
    returns (B, output_dim) softmax probabilities.
    """
    B, T, Din = x_btd.shape
    num_layers = len(params["lstm"])
    H = params["lstm"][0]["w_hh_t"].shape[0]
    F = params["fc1_w_t"].shape[1]
    O = params["fc2_w_t"].shape[1]

    # Pad batch to a multiple of 8 sublanes; kernel works time-major, flattened
    # to (T*Bp, Din) so every kernel tensor is 2-D and sublane-aligned.
    Bp = ((B + 7) // 8) * 8
    x_tbd = jnp.transpose(x_btd, (1, 0, 2)).astype(jnp.float32)   # (T, B, Din)
    x_pad = jnp.pad(x_tbd, ((0, 0), (0, Bp - B), (0, 0)))         # (T, Bp, Din)
    x2d = x_pad.reshape(T * Bp, Din)

    inputs = [x2d]
    in_specs = [pl.BlockSpec((T * Bp, Din), lambda i: (0, 0))]
    for l in range(num_layers):
        layer = params["lstm"][l]
        din_l = Din if l == 0 else H
        inputs += [layer["w_ih_t"], layer["w_hh_t"], layer["bias"]]
        in_specs += [
            pl.BlockSpec((din_l, 4 * H), lambda i: (0, 0)),
            pl.BlockSpec((H, 4 * H), lambda i: (0, 0)),
            pl.BlockSpec((1, 4 * H), lambda i: (0, 0)),
        ]
    inputs += [params["fc1_w_t"], params["fc1_b"],
               params["fc2_w_t"], params["fc2_b"]]
    in_specs += [
        pl.BlockSpec((H, F), lambda i: (0, 0)),
        pl.BlockSpec((1, F), lambda i: (0, 0)),
        pl.BlockSpec((F, O), lambda i: (0, 0)),
        pl.BlockSpec((1, O), lambda i: (0, 0)),
    ]

    grid_spec = pltpu.PrefetchScalarGridSpec(
        num_scalar_prefetch=0,
        grid=(1,),
        in_specs=in_specs,
        out_specs=pl.BlockSpec((Bp, O), lambda i: (0, 0)),
        scratch_shapes=[
            pltpu.VMEM((T * Bp, H), jnp.float32),   # inter-layer hidden sequence
        ],
    )

    out = pl.pallas_call(
        _make_fused_kernel(num_layers, T, Bp, H),
        out_shape=jax.ShapeDtypeStruct((Bp, O), jnp.float32),
        grid_spec=grid_spec,
        compiler_params=pltpu.CompilerParams(
            dimension_semantics=("arbitrary",)),
    )(*inputs)

    return out[:B]


# ---------------------------------------------------------------------------
# Parameter init (PyTorch-shaped, stored pre-transposed for the kernel)
# ---------------------------------------------------------------------------

def init_params(key, input_dim, hidden_dim, output_dim, num_layers, fc_hidden_dim):
    params = {"lstm": []}
    H = hidden_dim
    bound = 1.0 / jnp.sqrt(jnp.float32(H))
    for l in range(num_layers):
        din = input_dim if l == 0 else hidden_dim
        key, k1, k2, k3, k4 = jax.random.split(key, 5)
        w_ih_t = jax.random.uniform(k1, (din, 4 * H), jnp.float32, -bound, bound)
        w_hh_t = jax.random.uniform(k2, (H, 4 * H), jnp.float32, -bound, bound)
        b_ih = jax.random.uniform(k3, (4 * H,), jnp.float32, -bound, bound)
        b_hh = jax.random.uniform(k4, (4 * H,), jnp.float32, -bound, bound)
        params["lstm"].append(
            {"w_ih_t": w_ih_t, "w_hh_t": w_hh_t,
             "bias": (b_ih + b_hh).reshape(1, 4 * H)})

    key, k1, k2, k3, k4 = jax.random.split(key, 5)
    b1f = 1.0 / jnp.sqrt(jnp.float32(hidden_dim))
    b2f = 1.0 / jnp.sqrt(jnp.float32(fc_hidden_dim))
    params["fc1_w_t"] = jax.random.uniform(
        k1, (hidden_dim, fc_hidden_dim), jnp.float32, -b1f, b1f)
    params["fc1_b"] = jax.random.uniform(
        k2, (1, fc_hidden_dim), jnp.float32, -b1f, b1f)
    params["fc2_w_t"] = jax.random.uniform(
        k3, (fc_hidden_dim, output_dim), jnp.float32, -b2f, b2f)
    params["fc2_b"] = jax.random.uniform(
        k4, (1, output_dim), jnp.float32, -b2f, b2f)
    return params


# Pure-JAX reference (same math, per-step) for correctness checking.
def lstm_model_reference(params, x_btd):
    x = jnp.transpose(x_btd, (1, 0, 2)).astype(jnp.float32)  # (T, B, Din)
    T, B, _ = x.shape
    h_seq = x
    for layer in params["lstm"]:
        H = layer["w_hh_t"].shape[0]
        h = jnp.zeros((B, H), jnp.float32)
        c = jnp.zeros((B, H), jnp.float32)
        outs = []
        for t in range(T):
            gates = h_seq[t] @ layer["w_ih_t"] + h @ layer["w_hh_t"] + layer["bias"]
            i = jax.nn.sigmoid(gates[:, 0 * H:1 * H])
            f = jax.nn.sigmoid(gates[:, 1 * H:2 * H])
            g = jnp.tanh(gates[:, 2 * H:3 * H])
            o = jax.nn.sigmoid(gates[:, 3 * H:4 * H])
            c = f * c + i * g
            h = o * jnp.tanh(c)
            outs.append(h)
        h_seq = jnp.stack(outs, axis=0)
    z1 = jnp.maximum(h_seq[-1] @ params["fc1_w_t"] + params["fc1_b"], 0.0)
    z2 = z1 @ params["fc2_w_t"] + params["fc2_b"]
    return jax.nn.softmax(z2, axis=-1)


if __name__ == "__main__":
    # Small shapes consistent with the module's forward.
    batch, seq_len = 2, 8
    input_dim, hidden_dim, output_dim = 16, 32, 2
    num_layers, fc_hidden_dim = 2, 16

    key = jax.random.PRNGKey(0)
    key, pkey, xkey = jax.random.split(key, 3)

    params = init_params(pkey, input_dim, hidden_dim, output_dim,
                         num_layers, fc_hidden_dim)
    x = jax.random.normal(xkey, (batch, seq_len, input_dim), jnp.float32)

    out = lstm_model_forward(params, x)
    out = jax.block_until_ready(out)

    assert out.shape == (batch, output_dim)
    assert bool(jnp.all(jnp.isfinite(out)))
    # softmax rows must sum to 1
    assert bool(jnp.allclose(jnp.sum(out, axis=1), 1.0, atol=1e-5))
    # match the pure-JAX reference
    ref = lstm_model_reference(params, x)
    assert bool(jnp.allclose(out, ref, rtol=1e-4, atol=1e-4))
    print("KERNEL_OK")
</pallas_src>

<mosaic_0001>
module attributes {stable_mosaic.version = 11 : i64} {
  func.func @kernel(%arg0: i32, %arg1: memref<64x16xf32, #tpu.memory_space<vmem>>, %arg2: memref<16x128xf32, #tpu.memory_space<vmem>>, %arg3: memref<32x128xf32, #tpu.memory_space<vmem>>, %arg4: memref<1x128xf32, #tpu.memory_space<vmem>>, %arg5: memref<32x128xf32, #tpu.memory_space<vmem>>, %arg6: memref<32x128xf32, #tpu.memory_space<vmem>>, %arg7: memref<1x128xf32, #tpu.memory_space<vmem>>, %arg8: memref<32x16xf32, #tpu.memory_space<vmem>>, %arg9: memref<1x16xf32, #tpu.memory_space<vmem>>, %arg10: memref<16x2xf32, #tpu.memory_space<vmem>>, %arg11: memref<1x2xf32, #tpu.memory_space<vmem>>, %arg12: memref<8x2xf32, #tpu.memory_space<vmem>>, %arg13: memref<64x32xf32, #tpu.memory_space<vmem>>) attributes {dimension_semantics = [#tpu.dimension_semantics<arbitrary>], iteration_bounds = array<i64: 1>, scalar_prefetch = 0 : i64, scratch_operands = 1 : i64, tpu.core_type = #tpu.core_type<tc>, window_params = [{pipeline_mode = #tpu.pipeline_mode<synchronous>, transform_indices = @transform_0, window_bounds = array<i64: 64, 16>}, {pipeline_mode = #tpu.pipeline_mode<synchronous>, transform_indices = @transform_1, window_bounds = array<i64: 16, 128>}, {pipeline_mode = #tpu.pipeline_mode<synchronous>, transform_indices = @transform_2, window_bounds = array<i64: 32, 128>}, {pipeline_mode = #tpu.pipeline_mode<synchronous>, transform_indices = @transform_3, window_bounds = array<i64: 1, 128>}, {pipeline_mode = #tpu.pipeline_mode<synchronous>, transform_indices = @transform_4, window_bounds = array<i64: 32, 128>}, {pipeline_mode = #tpu.pipeline_mode<synchronous>, transform_indices = @transform_5, window_bounds = array<i64: 32, 128>}, {pipeline_mode = #tpu.pipeline_mode<synchronous>, transform_indices = @transform_6, window_bounds = array<i64: 1, 128>}, {pipeline_mode = #tpu.pipeline_mode<synchronous>, transform_indices = @transform_7, window_bounds = array<i64: 32, 16>}, {pipeline_mode = #tpu.pipeline_mode<synchronous>, transform_indices = @transform_8, window_bounds = array<i64: 1, 16>}, {pipeline_mode = #tpu.pipeline_mode<synchronous>, transform_indices = @transform_9, window_bounds = array<i64: 16, 2>}, {pipeline_mode = #tpu.pipeline_mode<synchronous>, transform_indices = @transform_10, window_bounds = array<i64: 1, 2>}, {pipeline_mode = #tpu.pipeline_mode<synchronous>, transform_indices = @transform_11, window_bounds = array<i64: 8, 2>}]} {
    %c0 = arith.constant 0 : index
    %c0_0 = arith.constant 0 : index
    %0 = vector.load %arg2[%c0, %c0_0] : memref<16x128xf32, #tpu.memory_space<vmem>>, vector<16x128xf32>
    %c0_1 = arith.constant 0 : index
    %c0_2 = arith.constant 0 : index
    %1 = vector.load %arg3[%c0_1, %c0_2] : memref<32x128xf32, #tpu.memory_space<vmem>>, vector<32x128xf32>
    %c0_3 = arith.constant 0 : index
    %c0_4 = arith.constant 0 : index
    %2 = vector.load %arg4[%c0_3, %c0_4] : memref<1x128xf32, #tpu.memory_space<vmem>>, vector<1x128xf32>
    %c0_5 = arith.constant 0 : index
    %c0_6 = arith.constant 0 : index
    %3 = vector.load %arg1[%c0_5, %c0_6] : memref<64x16xf32, #tpu.memory_space<vmem>>, vector<64x16xf32>
    %cst = arith.constant dense<0.000000e+00> : vector<64x128xf32>
    %4 = tpu.matmul %3, %0, %cst {dimension_numbers = #tpu.dot_dimension_numbers<[1], [0], [0], [1], [0, 0, 1, 1], [], []>} : vector<64x16xf32>, vector<16x128xf32>, vector<64x128xf32> -> vector<64x128xf32>
    %5 = vector.broadcast %2 : vector<1x128xf32> to vector<64x128xf32>
    %6 = arith.addf %4, %5 : vector<64x128xf32>
    %cst_7 = arith.constant 0.000000e+00 : f32
    %7 = vector.broadcast %cst_7 : f32 to vector<8x32xf32>
    %cst_8 = arith.constant 0.000000e+00 : f32
    %8 = vector.broadcast %cst_8 : f32 to vector<8x32xf32>
    %9 = vector.extract_strided_slice %6 {offsets = [0, 0], sizes = [8, 128], strides = [1, 1]} : vector<64x128xf32> to vector<8x128xf32>
    %cst_9 = arith.constant dense<0.000000e+00> : vector<8x128xf32>
    %10 = tpu.matmul %7, %1, %cst_9 {dimension_numbers = #tpu.dot_dimension_numbers<[1], [0], [0], [1], [0, 0, 1, 1], [], []>} : vector<8x32xf32>, vector<32x128xf32>, vector<8x128xf32> -> vector<8x128xf32>
    %11 = arith.addf %9, %10 : vector<8x128xf32>
    %12 = arith.negf %11 : vector<8x128xf32>
    %13 = math.exp %12 : vector<8x128xf32>
    %cst_10 = arith.constant 1.000000e+00 : f32
    %14 = vector.broadcast %cst_10 : f32 to vector<8x128xf32>
    %15 = arith.addf %14, %13 : vector<8x128xf32>
    %16 = arith.divf %14, %15 : vector<8x128xf32>
    %17 = math.tanh %11 : vector<8x128xf32>
    %18 = vector.extract_strided_slice %16 {offsets = [0, 0], sizes = [8, 32], strides = [1, 1]} : vector<8x128xf32> to vector<8x32xf32>
    %19 = vector.extract_strided_slice %16 {offsets = [0, 32], sizes = [8, 32], strides = [1, 1]} : vector<8x128xf32> to vector<8x32xf32>
    %20 = vector.extract_strided_slice %17 {offsets = [0, 64], sizes = [8, 32], strides = [1, 1]} : vector<8x128xf32> to vector<8x32xf32>
    %21 = vector.extract_strided_slice %16 {offsets = [0, 96], sizes = [8, 32], strides = [1, 1]} : vector<8x128xf32> to vector<8x32xf32>
    %22 = arith.mulf %19, %8 : vector<8x32xf32>
    %23 = arith.mulf %18, %20 : vector<8x32xf32>
    %24 = arith.addf %22, %23 : vector<8x32xf32>
    %25 = math.tanh %24 : vector<8x32xf32>
    %26 = arith.mulf %21, %25 : vector<8x32xf32>
    %c0_11 = arith.constant 0 : index
    %c0_12 = arith.constant 0 : index
    %27 = vector.load %arg13[%c0_11, %c0_12] : memref<64x32xf32, #tpu.memory_space<vmem>>, vector<8x32xf32>
    tpu.vector_store %arg13[%c0_11, %c0_12], %26 {strides = array<i32>} : memref<64x32xf32, #tpu.memory_space<vmem>>, vector<8x32xf32>,
    %28 = vector.extract_strided_slice %6 {offsets = [8, 0], sizes = [8, 128], strides = [1, 1]} : vector<64x128xf32> to vector<8x128xf32>
    %cst_13 = arith.constant dense<0.000000e+00> : vector<8x128xf32>
    %29 = tpu.matmul %26, %1, %cst_13 {dimension_numbers = #tpu.dot_dimension_numbers<[1], [0], [0], [1], [0, 0, 1, 1], [], []>} : vector<8x32xf32>, vector<32x128xf32>, vector<8x128xf32> -> vector<8x128xf32>
    %30 = arith.addf %28, %29 : vector<8x128xf32>
    %31 = arith.negf %30 : vector<8x128xf32>
    %32 = math.exp %31 : vector<8x128xf32>
    %cst_14 = arith.constant 1.000000e+00 : f32
    %33 = vector.broadcast %cst_14 : f32 to vector<8x128xf32>
    %34 = arith.addf %33, %32 : vector<8x128xf32>
    %35 = arith.divf %33, %34 : vector<8x128xf32>
    %36 = math.tanh %30 : vector<8x128xf32>
    %37 = vector.extract_strided_slice %35 {offsets = [0, 0], sizes = [8, 32], strides = [1, 1]} : vector<8x128xf32> to vector<8x32xf32>
    %38 = vector.extract_strided_slice %35 {offsets = [0, 32], sizes = [8, 32], strides = [1, 1]} : vector<8x128xf32> to vector<8x32xf32>
    %39 = vector.extract_strided_slice %36 {offsets = [0, 64], sizes = [8, 32], strides = [1, 1]} : vector<8x128xf32> to vector<8x32xf32>
    %40 = vector.extract_strided_slice %35 {offsets = [0, 96], sizes = [8, 32], strides = [1, 1]} : vector<8x128xf32> to vector<8x32xf32>
    %41 = arith.mulf %38, %24 : vector<8x32xf32>
    %42 = arith.mulf %37, %39 : vector<8x32xf32>
    %43 = arith.addf %41, %42 : vector<8x32xf32>
    %44 = math.tanh %43 : vector<8x32xf32>
    %45 = arith.mulf %40, %44 : vector<8x32xf32>
    %c8 = arith.constant 8 : index
    %c0_15 = arith.constant 0 : index
    %46 = vector.load %arg13[%c8, %c0_15] : memref<64x32xf32, #tpu.memory_space<vmem>>, vector<8x32xf32>
    tpu.vector_store %arg13[%c8, %c0_15], %45 {strides = array<i32>} : memref<64x32xf32, #tpu.memory_space<vmem>>, vector<8x32xf32>,
    %47 = vector.extract_strided_slice %6 {offsets = [16, 0], sizes = [8, 128], strides = [1, 1]} : vector<64x128xf32> to vector<8x128xf32>
    %cst_16 = arith.constant dense<0.000000e+00> : vector<8x128xf32>
    %48 = tpu.matmul %45, %1, %cst_16 {dimension_numbers = #tpu.dot_dimension_numbers<[1], [0], [0], [1], [0, 0, 1, 1], [], []>} : vector<8x32xf32>, vector<32x128xf32>, vector<8x128xf32> -> vector<8x128xf32>
    %49 = arith.addf %47, %48 : vector<8x128xf32>
    %50 = arith.negf %49 : vector<8x128xf32>
    %51 = math.exp %50 : vector<8x128xf32>
    %cst_17 = arith.constant 1.000000e+00 : f32
    %52 = vector.broadcast %cst_17 : f32 to vector<8x128xf32>
    %53 = arith.addf %52, %51 : vector<8x128xf32>
    %54 = arith.divf %52, %53 : vector<8x128xf32>
    %55 = math.tanh %49 : vector<8x128xf32>
    %56 = vector.extract_strided_slice %54 {offsets = [0, 0], sizes = [8, 32], strides = [1, 1]} : vector<8x128xf32> to vector<8x32xf32>
    %57 = vector.extract_strided_slice %54 {offsets = [0, 32], sizes = [8, 32], strides = [1, 1]} : vector<8x128xf32> to vector<8x32xf32>
    %58 = vector.extract_strided_slice %55 {offsets = [0, 64], sizes = [8, 32], strides = [1, 1]} : vector<8x128xf32> to vector<8x32xf32>
    %59 = vector.extract_strided_slice %54 {offsets = [0, 96], sizes = [8, 32], strides = [1, 1]} : vector<8x128xf32> to vector<8x32xf32>
    %60 = arith.mulf %57, %43 : vector<8x32xf32>
    %61 = arith.mulf %56, %58 : vector<8x32xf32>
    %62 = arith.addf %60, %61 : vector<8x32xf32>
    %63 = math.tanh %62 : vector<8x32xf32>
    %64 = arith.mulf %59, %63 : vector<8x32xf32>
    %c16 = arith.constant 16 : index
    %c0_18 = arith.constant 0 : index
    %65 = vector.load %arg13[%c16, %c0_18] : memref<64x32xf32, #tpu.memory_space<vmem>>, vector<8x32xf32>
    tpu.vector_store %arg13[%c16, %c0_18], %64 {strides = array<i32>} : memref<64x32xf32, #tpu.memory_space<vmem>>, vector<8x32xf32>,
    %66 = vector.extract_strided_slice %6 {offsets = [24, 0], sizes = [8, 128], strides = [1, 1]} : vector<64x128xf32> to vector<8x128xf32>
    %cst_19 = arith.constant dense<0.000000e+00> : vector<8x128xf32>
    %67 = tpu.matmul %64, %1, %cst_19 {dimension_numbers = #tpu.dot_dimension_numbers<[1], [0], [0], [1], [0, 0, 1, 1], [], []>} : vector<8x32xf32>, vector<32x128xf32>, vector<8x128xf32> -> vector<8x128xf32>
    %68 = arith.addf %66, %67 : vector<8x128xf32>
    %69 = arith.negf %68 : vector<8x128xf32>
    %70 = math.exp %69 : vector<8x128xf32>
    %cst_20 = arith.constant 1.000000e+00 : f32
    %71 = vector.broadcast %cst_20 : f32 to vector<8x128xf32>
    %72 = arith.addf %71, %70 : vector<8x128xf32>
    %73 = arith.divf %71, %72 : vector<8x128xf32>
    %74 = math.tanh %68 : vector<8x128xf32>
    %75 = vector.extract_strided_slice %73 {offsets = [0, 0], sizes = [8, 32], strides = [1, 1]} : vector<8x128xf32> to vector<8x32xf32>
    %76 = vector.extract_strided_slice %73 {offsets = [0, 32], sizes = [8, 32], strides = [1, 1]} : vector<8x128xf32> to vector<8x32xf32>
    %77 = vector.extract_strided_slice %74 {offsets = [0, 64], sizes = [8, 32], strides = [1, 1]} : vector<8x128xf32> to vector<8x32xf32>
    %78 = vector.extract_strided_slice %73 {offsets = [0, 96], sizes = [8, 32], strides = [1, 1]} : vector<8x128xf32> to vector<8x32xf32>
    %79 = arith.mulf %76, %62 : vector<8x32xf32>
    %80 = arith.mulf %75, %77 : vector<8x32xf32>
    %81 = arith.addf %79, %80 : vector<8x32xf32>
    %82 = math.tanh %81 : vector<8x32xf32>
    %83 = arith.mulf %78, %82 : vector<8x32xf32>
    %c24 = arith.constant 24 : index
    %c0_21 = arith.constant 0 : index
    %84 = vector.load %arg13[%c24, %c0_21] : memref<64x32xf32, #tpu.memory_space<vmem>>, vector<8x32xf32>
    tpu.vector_store %arg13[%c24, %c0_21], %83 {strides = array<i32>} : memref<64x32xf32, #tpu.memory_space<vmem>>, vector<8x32xf32>,
    %85 = vector.extract_strided_slice %6 {offsets = [32, 0], sizes = [8, 128], strides = [1, 1]} : vector<64x128xf32> to vector<8x128xf32>
    %cst_22 = arith.constant dense<0.000000e+00> : vector<8x128xf32>
    %86 = tpu.matmul %83, %1, %cst_22 {dimension_numbers = #tpu.dot_dimension_numbers<[1], [0], [0], [1], [0, 0, 1, 1], [], []>} : vector<8x32xf32>, vector<32x128xf32>, vector<8x128xf32> -> vector<8x128xf32>
    %87 = arith.addf %85, %86 : vector<8x128xf32>
    %88 = arith.negf %87 : vector<8x128xf32>
    %89 = math.exp %88 : vector<8x128xf32>
    %cst_23 = arith.constant 1.000000e+00 : f32
    %90 = vector.broadcast %cst_23 : f32 to vector<8x128xf32>
    %91 = arith.addf %90, %89 : vector<8x128xf32>
    %92 = arith.divf %90, %91 : vector<8x128xf32>
    %93 = math.tanh %87 : vector<8x128xf32>
    %94 = vector.extract_strided_slice %92 {offsets = [0, 0], sizes = [8, 32], strides = [1, 1]} : vector<8x128xf32> to vector<8x32xf32>
    %95 = vector.extract_strided_slice %92 {offsets = [0, 32], sizes = [8, 32], strides = [1, 1]} : vector<8x128xf32> to vector<8x32xf32>
    %96 = vector.extract_strided_slice %93 {offsets = [0, 64], sizes = [8, 32], strides = [1, 1]} : vector<8x128xf32> to vector<8x32xf32>
    %97 = vector.extract_strided_slice %92 {offsets = [0, 96], sizes = [8, 32], strides = [1, 1]} : vector<8x128xf32> to vector<8x32xf32>
    %98 = arith.mulf %95, %81 : vector<8x32xf32>
    %99 = arith.mulf %94, %96 : vector<8x32xf32>
    %100 = arith.addf %98, %99 : vector<8x32xf32>
    %101 = math.tanh %100 : vector<8x32xf32>
    %102 = arith.mulf %97, %101 : vector<8x32xf32>
    %c32 = arith.constant 32 : index
    %c0_24 = arith.constant 0 : index
    %103 = vector.load %arg13[%c32, %c0_24] : memref<64x32xf32, #tpu.memory_space<vmem>>, vector<8x32xf32>
    tpu.vector_store %arg13[%c32, %c0_24], %102 {strides = array<i32>} : memref<64x32xf32, #tpu.memory_space<vmem>>, vector<8x32xf32>,
    %104 = vector.extract_strided_slice %6 {offsets = [40, 0], sizes = [8, 128], strides = [1, 1]} : vector<64x128xf32> to vector<8x128xf32>
    %cst_25 = arith.constant dense<0.000000e+00> : vector<8x128xf32>
    %105 = tpu.matmul %102, %1, %cst_25 {dimension_numbers = #tpu.dot_dimension_numbers<[1], [0], [0], [1], [0, 0, 1, 1], [], []>} : vector<8x32xf32>, vector<32x128xf32>, vector<8x128xf32> -> vector<8x128xf32>
    %106 = arith.addf %104, %105 : vector<8x128xf32>
    %107 = arith.negf %106 : vector<8x128xf32>
    %108 = math.exp %107 : vector<8x128xf32>
    %cst_26 = arith.constant 1.000000e+00 : f32
    %109 = vector.broadcast %cst_26 : f32 to vector<8x128xf32>
    %110 = arith.addf %109, %108 : vector<8x128xf32>
    %111 = arith.divf %109, %110 : vector<8x128xf32>
    %112 = math.tanh %106 : vector<8x128xf32>
    %113 = vector.extract_strided_slice %111 {offsets = [0, 0], sizes = [8, 32], strides = [1, 1]} : vector<8x128xf32> to vector<8x32xf32>
    %114 = vector.extract_strided_slice %111 {offsets = [0, 32], sizes = [8, 32], strides = [1, 1]} : vector<8x128xf32> to vector<8x32xf32>
    %115 = vector.extract_strided_slice %112 {offsets = [0, 64], sizes = [8, 32], strides = [1, 1]} : vector<8x128xf32> to vector<8x32xf32>
    %116 = vector.extract_strided_slice %111 {offsets = [0, 96], sizes = [8, 32], strides = [1, 1]} : vector<8x128xf32> to vector<8x32xf32>
    %117 = arith.mulf %114, %100 : vector<8x32xf32>
    %118 = arith.mulf %113, %115 : vector<8x32xf32>
    %119 = arith.addf %117, %118 : vector<8x32xf32>
    %120 = math.tanh %119 : vector<8x32xf32>
    %121 = arith.mulf %116, %120 : vector<8x32xf32>
    %c40 = arith.constant 40 : index
    %c0_27 = arith.constant 0 : index
    %122 = vector.load %arg13[%c40, %c0_27] : memref<64x32xf32, #tpu.memory_space<vmem>>, vector<8x32xf32>
    tpu.vector_store %arg13[%c40, %c0_27], %121 {strides = array<i32>} : memref<64x32xf32, #tpu.memory_space<vmem>>, vector<8x32xf32>,
    %123 = vector.extract_strided_slice %6 {offsets = [48, 0], sizes = [8, 128], strides = [1, 1]} : vector<64x128xf32> to vector<8x128xf32>
    %cst_28 = arith.constant dense<0.000000e+00> : vector<8x128xf32>
    %124 = tpu.matmul %121, %1, %cst_28 {dimension_numbers = #tpu.dot_dimension_numbers<[1], [0], [0], [1], [0, 0, 1, 1], [], []>} : vector<8x32xf32>, vector<32x128xf32>, vector<8x128xf32> -> vector<8x128xf32>
    %125 = arith.addf %123, %124 : vector<8x128xf32>
    %126 = arith.negf %125 : vector<8x128xf32>
    %127 = math.exp %126 : vector<8x128xf32>
    %cst_29 = arith.constant 1.000000e+00 : f32
    %128 = vector.broadcast %cst_29 : f32 to vector<8x128xf32>
    %129 = arith.addf %128, %127 : vector<8x128xf32>
    %130 = arith.divf %128, %129 : vector<8x128xf32>
    %131 = math.tanh %125 : vector<8x128xf32>
    %132 = vector.extract_strided_slice %130 {offsets = [0, 0], sizes = [8, 32], strides = [1, 1]} : vector<8x128xf32> to vector<8x32xf32>
    %133 = vector.extract_strided_slice %130 {offsets = [0, 32], sizes = [8, 32], strides = [1, 1]} : vector<8x128xf32> to vector<8x32xf32>
    %134 = vector.extract_strided_slice %131 {offsets = [0, 64], sizes = [8, 32], strides = [1, 1]} : vector<8x128xf32> to vector<8x32xf32>
    %135 = vector.extract_strided_slice %130 {offsets = [0, 96], sizes = [8, 32], strides = [1, 1]} : vector<8x128xf32> to vector<8x32xf32>
    %136 = arith.mulf %133, %119 : vector<8x32xf32>
    %137 = arith.mulf %132, %134 : vector<8x32xf32>
    %138 = arith.addf %136, %137 : vector<8x32xf32>
    %139 = math.tanh %138 : vector<8x32xf32>
    %140 = arith.mulf %135, %139 : vector<8x32xf32>
    %c48 = arith.constant 48 : index
    %c0_30 = arith.constant 0 : index
    %141 = vector.load %arg13[%c48, %c0_30] : memref<64x32xf32, #tpu.memory_space<vmem>>, vector<8x32xf32>
    tpu.vector_store %arg13[%c48, %c0_30], %140 {strides = array<i32>} : memref<64x32xf32, #tpu.memory_space<vmem>>, vector<8x32xf32>,
    %142 = vector.extract_strided_slice %6 {offsets = [56, 0], sizes = [8, 128], strides = [1, 1]} : vector<64x128xf32> to vector<8x128xf32>
    %cst_31 = arith.constant dense<0.000000e+00> : vector<8x128xf32>
    %143 = tpu.matmul %140, %1, %cst_31 {dimension_numbers = #tpu.dot_dimension_numbers<[1], [0], [0], [1], [0, 0, 1, 1], [], []>} : vector<8x32xf32>, vector<32x128xf32>, vector<8x128xf32> -> vector<8x128xf32>
    %144 = arith.addf %142, %143 : vector<8x128xf32>
    %145 = arith.negf %144 : vector<8x128xf32>
    %146 = math.exp %145 : vector<8x128xf32>
    %cst_32 = arith.constant 1.000000e+00 : f32
    %147 = vector.broadcast %cst_32 : f32 to vector<8x128xf32>
    %148 = arith.addf %147, %146 : vector<8x128xf32>
    %149 = arith.divf %147, %148 : vector<8x128xf32>
    %150 = math.tanh %144 : vector<8x128xf32>
    %151 = vector.extract_strided_slice %149 {offsets = [0, 0], sizes = [8, 32], strides = [1, 1]} : vector<8x128xf32> to vector<8x32xf32>
    %152 = vector.extract_strided_slice %149 {offsets = [0, 32], sizes = [8, 32], strides = [1, 1]} : vector<8x128xf32> to vector<8x32xf32>
    %153 = vector.extract_strided_slice %150 {offsets = [0, 64], sizes = [8, 32], strides = [1, 1]} : vector<8x128xf32> to vector<8x32xf32>
    %154 = vector.extract_strided_slice %149 {offsets = [0, 96], sizes = [8, 32], strides = [1, 1]} : vector<8x128xf32> to vector<8x32xf32>
    %155 = arith.mulf %152, %138 : vector<8x32xf32>
    %156 = arith.mulf %151, %153 : vector<8x32xf32>
    %157 = arith.addf %155, %156 : vector<8x32xf32>
    %158 = math.tanh %157 : vector<8x32xf32>
    %159 = arith.mulf %154, %158 : vector<8x32xf32>
    %c56 = arith.constant 56 : index
    %c0_33 = arith.constant 0 : index
    %160 = vector.load %arg13[%c56, %c0_33] : memref<64x32xf32, #tpu.memory_space<vmem>>, vector<8x32xf32>
    tpu.vector_store %arg13[%c56, %c0_33], %159 {strides = array<i32>} : memref<64x32xf32, #tpu.memory_space<vmem>>, vector<8x32xf32>,
    %c0_34 = arith.constant 0 : index
    %c0_35 = arith.constant 0 : index
    %161 = vector.load %arg5[%c0_34, %c0_35] : memref<32x128xf32, #tpu.memory_space<vmem>>, vector<32x128xf32>
    %c0_36 = arith.constant 0 : index
    %c0_37 = arith.constant 0 : index
    %162 = vector.load %arg6[%c0_36, %c0_37] : memref<32x128xf32, #tpu.memory_space<vmem>>, vector<32x128xf32>
    %c0_38 = arith.constant 0 : index
    %c0_39 = arith.constant 0 : index
    %163 = vector.load %arg7[%c0_38, %c0_39] : memref<1x128xf32, #tpu.memory_space<vmem>>, vector<1x128xf32>
    %c0_40 = arith.constant 0 : index
    %c0_41 = arith.constant 0 : index
    %164 = vector.load %arg13[%c0_40, %c0_41] : memref<64x32xf32, #tpu.memory_space<vmem>>, vector<64x32xf32>
    %cst_42 = arith.constant dense<0.000000e+00> : vector<64x128xf32>
    %165 = tpu.matmul %164, %161, %cst_42 {dimension_numbers = #tpu.dot_dimension_numbers<[1], [0], [0], [1], [0, 0, 1, 1], [], []>} : vector<64x32xf32>, vector<32x128xf32>, vector<64x128xf32> -> vector<64x128xf32>
    %166 = vector.broadcast %163 : vector<1x128xf32> to vector<64x128xf32>
    %167 = arith.addf %165, %166 : vector<64x128xf32>
    %cst_43 = arith.constant 0.000000e+00 : f32
    %168 = vector.broadcast %cst_43 : f32 to vector<8x32xf32>
    %cst_44 = arith.constant 0.000000e+00 : f32
    %169 = vector.broadcast %cst_44 : f32 to vector<8x32xf32>
    %170 = vector.extract_strided_slice %167 {offsets = [0, 0], sizes = [8, 128], strides = [1, 1]} : vector<64x128xf32> to vector<8x128xf32>
    %cst_45 = arith.constant dense<0.000000e+00> : vector<8x128xf32>
    %171 = tpu.matmul %168, %162, %cst_45 {dimension_numbers = #tpu.dot_dimension_numbers<[1], [0], [0], [1], [0, 0, 1, 1], [], []>} : vector<8x32xf32>, vector<32x128xf32>, vector<8x128xf32> -> vector<8x128xf32>
    %172 = arith.addf %170, %171 : vector<8x128xf32>
    %173 = arith.negf %172 : vector<8x128xf32>
    %174 = math.exp %173 : vector<8x128xf32>
    %cst_46 = arith.constant 1.000000e+00 : f32
    %175 = vector.broadcast %cst_46 : f32 to vector<8x128xf32>
    %176 = arith.addf %175, %174 : vector<8x128xf32>
    %177 = arith.divf %175, %176 : vector<8x128xf32>
    %178 = math.tanh %172 : vector<8x128xf32>
    %179 = vector.extract_strided_slice %177 {offsets = [0, 0], sizes = [8, 32], strides = [1, 1]} : vector<8x128xf32> to vector<8x32xf32>
    %180 = vector.extract_strided_slice %177 {offsets = [0, 32], sizes = [8, 32], strides = [1, 1]} : vector<8x128xf32> to vector<8x32xf32>
    %181 = vector.extract_strided_slice %178 {offsets = [0, 64], sizes = [8, 32], strides = [1, 1]} : vector<8x128xf32> to vector<8x32xf32>
    %182 = vector.extract_strided_slice %177 {offsets = [0, 96], sizes = [8, 32], strides = [1, 1]} : vector<8x128xf32> to vector<8x32xf32>
    %183 = arith.mulf %180, %169 : vector<8x32xf32>
    %184 = arith.mulf %179, %181 : vector<8x32xf32>
    %185 = arith.addf %183, %184 : vector<8x32xf32>
    %186 = math.tanh %185 : vector<8x32xf32>
    %187 = arith.mulf %182, %186 : vector<8x32xf32>
    %188 = vector.extract_strided_slice %167 {offsets = [8, 0], sizes = [8, 128], strides = [1, 1]} : vector<64x128xf32> to vector<8x128xf32>
    %cst_47 = arith.constant dense<0.000000e+00> : vector<8x128xf32>
    %189 = tpu.matmul %187, %162, %cst_47 {dimension_numbers = #tpu.dot_dimension_numbers<[1], [0], [0], [1], [0, 0, 1, 1], [], []>} : vector<8x32xf32>, vector<32x128xf32>, vector<8x128xf32> -> vector<8x128xf32>
    %190 = arith.addf %188, %189 : vector<8x128xf32>
    %191 = arith.negf %190 : vector<8x128xf32>
    %192 = math.exp %191 : vector<8x128xf32>
    %cst_48 = arith.constant 1.000000e+00 : f32
    %193 = vector.broadcast %cst_48 : f32 to vector<8x128xf32>
    %194 = arith.addf %193, %192 : vector<8x128xf32>
    %195 = arith.divf %193, %194 : vector<8x128xf32>
    %196 = math.tanh %190 : vector<8x128xf32>
    %197 = vector.extract_strided_slice %195 {offsets = [0, 0], sizes = [8, 32], strides = [1, 1]} : vector<8x128xf32> to vector<8x32xf32>
    %198 = vector.extract_strided_slice %195 {offsets = [0, 32], sizes = [8, 32], strides = [1, 1]} : vector<8x128xf32> to vector<8x32xf32>
    %199 = vector.extract_strided_slice %196 {offsets = [0, 64], sizes = [8, 32], strides = [1, 1]} : vector<8x128xf32> to vector<8x32xf32>
    %200 = vector.extract_strided_slice %195 {offsets = [0, 96], sizes = [8, 32], strides = [1, 1]} : vector<8x128xf32> to vector<8x32xf32>
    %201 = arith.mulf %198, %185 : vector<8x32xf32>
    %202 = arith.mulf %197, %199 : vector<8x32xf32>
    %203 = arith.addf %201, %202 : vector<8x32xf32>
    %204 = math.tanh %203 : vector<8x32xf32>
    %205 = arith.mulf %200, %204 : vector<8x32xf32>
    %206 = vector.extract_strided_slice %167 {offsets = [16, 0], sizes = [8, 128], strides = [1, 1]} : vector<64x128xf32> to vector<8x128xf32>
    %cst_49 = arith.constant dense<0.000000e+00> : vector<8x128xf32>
    %207 = tpu.matmul %205, %162, %cst_49 {dimension_numbers = #tpu.dot_dimension_numbers<[1], [0], [0], [1], [0, 0, 1, 1], [], []>} : vector<8x32xf32>, vector<32x128xf32>, vector<8x128xf32> -> vector<8x128xf32>
    %208 = arith.addf %206, %207 : vector<8x128xf32>
    %209 = arith.negf %208 : vector<8x128xf32>
    %210 = math.exp %209 : vector<8x128xf32>
    %cst_50 = arith.constant 1.000000e+00 : f32
    %211 = vector.broadcast %cst_50 : f32 to vector<8x128xf32>
    %212 = arith.addf %211, %210 : vector<8x128xf32>
    %213 = arith.divf %211, %212 : vector<8x128xf32>
    %214 = math.tanh %208 : vector<8x128xf32>
    %215 = vector.extract_strided_slice %213 {offsets = [0, 0], sizes = [8, 32], strides = [1, 1]} : vector<8x128xf32> to vector<8x32xf32>
    %216 = vector.extract_strided_slice %213 {offsets = [0, 32], sizes = [8, 32], strides = [1, 1]} : vector<8x128xf32> to vector<8x32xf32>
    %217 = vector.extract_strided_slice %214 {offsets = [0, 64], sizes = [8, 32], strides = [1, 1]} : vector<8x128xf32> to vector<8x32xf32>
    %218 = vector.extract_strided_slice %213 {offsets = [0, 96], sizes = [8, 32], strides = [1, 1]} : vector<8x128xf32> to vector<8x32xf32>
    %219 = arith.mulf %216, %203 : vector<8x32xf32>
    %220 = arith.mulf %215, %217 : vector<8x32xf32>
    %221 = arith.addf %219, %220 : vector<8x32xf32>
    %222 = math.tanh %221 : vector<8x32xf32>
    %223 = arith.mulf %218, %222 : vector<8x32xf32>
    %224 = vector.extract_strided_slice %167 {offsets = [24, 0], sizes = [8, 128], strides = [1, 1]} : vector<64x128xf32> to vector<8x128xf32>
    %cst_51 = arith.constant dense<0.000000e+00> : vector<8x128xf32>
    %225 = tpu.matmul %223, %162, %cst_51 {dimension_numbers = #tpu.dot_dimension_numbers<[1], [0], [0], [1], [0, 0, 1, 1], [], []>} : vector<8x32xf32>, vector<32x128xf32>, vector<8x128xf32> -> vector<8x128xf32>
    %226 = arith.addf %224, %225 : vector<8x128xf32>
    %227 = arith.negf %226 : vector<8x128xf32>
    %228 = math.exp %227 : vector<8x128xf32>
    %cst_52 = arith.constant 1.000000e+00 : f32
    %229 = vector.broadcast %cst_52 : f32 to vector<8x128xf32>
    %230 = arith.addf %229, %228 : vector<8x128xf32>
    %231 = arith.divf %229, %230 : vector<8x128xf32>
    %232 = math.tanh %226 : vector<8x128xf32>
    %233 = vector.extract_strided_slice %231 {offsets = [0, 0], sizes = [8, 32], strides = [1, 1]} : vector<8x128xf32> to vector<8x32xf32>
    %234 = vector.extract_strided_slice %231 {offsets = [0, 32], sizes = [8, 32], strides = [1, 1]} : vector<8x128xf32> to vector<8x32xf32>
    %235 = vector.extract_strided_slice %232 {offsets = [0, 64], sizes = [8, 32], strides = [1, 1]} : vector<8x128xf32> to vector<8x32xf32>
    %236 = vector.extract_strided_slice %231 {offsets = [0, 96], sizes = [8, 32], strides = [1, 1]} : vector<8x128xf32> to vector<8x32xf32>
    %237 = arith.mulf %234, %221 : vector<8x32xf32>
    %238 = arith.mulf %233, %235 : vector<8x32xf32>
    %239 = arith.addf %237, %238 : vector<8x32xf32>
    %240 = math.tanh %239 : vector<8x32xf32>
    %241 = arith.mulf %236, %240 : vector<8x32xf32>
    %242 = vector.extract_strided_slice %167 {offsets = [32, 0], sizes = [8, 128], strides = [1, 1]} : vector<64x128xf32> to vector<8x128xf32>
    %cst_53 = arith.constant dense<0.000000e+00> : vector<8x128xf32>
    %243 = tpu.matmul %241, %162, %cst_53 {dimension_numbers = #tpu.dot_dimension_numbers<[1], [0], [0], [1], [0, 0, 1, 1], [], []>} : vector<8x32xf32>, vector<32x128xf32>, vector<8x128xf32> -> vector<8x128xf32>
    %244 = arith.addf %242, %243 : vector<8x128xf32>
    %245 = arith.negf %244 : vector<8x128xf32>
    %246 = math.exp %245 : vector<8x128xf32>
    %cst_54 = arith.constant 1.000000e+00 : f32
    %247 = vector.broadcast %cst_54 : f32 to vector<8x128xf32>
    %248 = arith.addf %247, %246 : vector<8x128xf32>
    %249 = arith.divf %247, %248 : vector<8x128xf32>
    %250 = math.tanh %244 : vector<8x128xf32>
    %251 = vector.extract_strided_slice %249 {offsets = [0, 0], sizes = [8, 32], strides = [1, 1]} : vector<8x128xf32> to vector<8x32xf32>
    %252 = vector.extract_strided_slice %249 {offsets = [0, 32], sizes = [8, 32], strides = [1, 1]} : vector<8x128xf32> to vector<8x32xf32>
    %253 = vector.extract_strided_slice %250 {offsets = [0, 64], sizes = [8, 32], strides = [1, 1]} : vector<8x128xf32> to vector<8x32xf32>
    %254 = vector.extract_strided_slice %249 {offsets = [0, 96], sizes = [8, 32], strides = [1, 1]} : vector<8x128xf32> to vector<8x32xf32>
    %255 = arith.mulf %252, %239 : vector<8x32xf32>
    %256 = arith.mulf %251, %253 : vector<8x32xf32>
    %257 = arith.addf %255, %256 : vector<8x32xf32>
    %258 = math.tanh %257 : vector<8x32xf32>
    %259 = arith.mulf %254, %258 : vector<8x32xf32>
    %260 = vector.extract_strided_slice %167 {offsets = [40, 0], sizes = [8, 128], strides = [1, 1]} : vector<64x128xf32> to vector<8x128xf32>
    %cst_55 = arith.constant dense<0.000000e+00> : vector<8x128xf32>
    %261 = tpu.matmul %259, %162, %cst_55 {dimension_numbers = #tpu.dot_dimension_numbers<[1], [0], [0], [1], [0, 0, 1, 1], [], []>} : vector<8x32xf32>, vector<32x128xf32>, vector<8x128xf32> -> vector<8x128xf32>
    %262 = arith.addf %260, %261 : vector<8x128xf32>
    %263 = arith.negf %262 : vector<8x128xf32>
    %264 = math.exp %263 : vector<8x128xf32>
    %cst_56 = arith.constant 1.000000e+00 : f32
    %265 = vector.broadcast %cst_56 : f32 to vector<8x128xf32>
    %266 = arith.addf %265, %264 : vector<8x128xf32>
    %267 = arith.divf %265, %266 : vector<8x128xf32>
    %268 = math.tanh %262 : vector<8x128xf32>
    %269 = vector.extract_strided_slice %267 {offsets = [0, 0], sizes = [8, 32], strides = [1, 1]} : vector<8x128xf32> to vector<8x32xf32>
    %270 = vector.extract_strided_slice %267 {offsets = [0, 32], sizes = [8, 32], strides = [1, 1]} : vector<8x128xf32> to vector<8x32xf32>
    %271 = vector.extract_strided_slice %268 {offsets = [0, 64], sizes = [8, 32], strides = [1, 1]} : vector<8x128xf32> to vector<8x32xf32>
    %272 = vector.extract_strided_slice %267 {offsets = [0, 96], sizes = [8, 32], strides = [1, 1]} : vector<8x128xf32> to vector<8x32xf32>
    %273 = arith.mulf %270, %257 : vector<8x32xf32>
    %274 = arith.mulf %269, %271 : vector<8x32xf32>
    %275 = arith.addf %273, %274 : vector<8x32xf32>
    %276 = math.tanh %275 : vector<8x32xf32>
    %277 = arith.mulf %272, %276 : vector<8x32xf32>
    %278 = vector.extract_strided_slice %167 {offsets = [48, 0], sizes = [8, 128], strides = [1, 1]} : vector<64x128xf32> to vector<8x128xf32>
    %cst_57 = arith.constant dense<0.000000e+00> : vector<8x128xf32>
    %279 = tpu.matmul %277, %162, %cst_57 {dimension_numbers = #tpu.dot_dimension_numbers<[1], [0], [0], [1], [0, 0, 1, 1], [], []>} : vector<8x32xf32>, vector<32x128xf32>, vector<8x128xf32> -> vector<8x128xf32>
    %280 = arith.addf %278, %279 : vector<8x128xf32>
    %281 = arith.negf %280 : vector<8x128xf32>
    %282 = math.exp %281 : vector<8x128xf32>
    %cst_58 = arith.constant 1.000000e+00 : f32
    %283 = vector.broadcast %cst_58 : f32 to vector<8x128xf32>
    %284 = arith.addf %283, %282 : vector<8x128xf32>
    %285 = arith.divf %283, %284 : vector<8x128xf32>
    %286 = math.tanh %280 : vector<8x128xf32>
    %287 = vector.extract_strided_slice %285 {offsets = [0, 0], sizes = [8, 32], strides = [1, 1]} : vector<8x128xf32> to vector<8x32xf32>
    %288 = vector.extract_strided_slice %285 {offsets = [0, 32], sizes = [8, 32], strides = [1, 1]} : vector<8x128xf32> to vector<8x32xf32>
    %289 = vector.extract_strided_slice %286 {offsets = [0, 64], sizes = [8, 32], strides = [1, 1]} : vector<8x128xf32> to vector<8x32xf32>
    %290 = vector.extract_strided_slice %285 {offsets = [0, 96], sizes = [8, 32], strides = [1, 1]} : vector<8x128xf32> to vector<8x32xf32>
    %291 = arith.mulf %288, %275 : vector<8x32xf32>
    %292 = arith.mulf %287, %289 : vector<8x32xf32>
    %293 = arith.addf %291, %292 : vector<8x32xf32>
    %294 = math.tanh %293 : vector<8x32xf32>
    %295 = arith.mulf %290, %294 : vector<8x32xf32>
    %296 = vector.extract_strided_slice %167 {offsets = [56, 0], sizes = [8, 128], strides = [1, 1]} : vector<64x128xf32> to vector<8x128xf32>
    %cst_59 = arith.constant dense<0.000000e+00> : vector<8x128xf32>
    %297 = tpu.matmul %295, %162, %cst_59 {dimension_numbers = #tpu.dot_dimension_numbers<[1], [0], [0], [1], [0, 0, 1, 1], [], []>} : vector<8x32xf32>, vector<32x128xf32>, vector<8x128xf32> -> vector<8x128xf32>
    %298 = arith.addf %296, %297 : vector<8x128xf32>
    %299 = arith.negf %298 : vector<8x128xf32>
    %300 = math.exp %299 : vector<8x128xf32>
    %cst_60 = arith.constant 1.000000e+00 : f32
    %301 = vector.broadcast %cst_60 : f32 to vector<8x128xf32>
    %302 = arith.addf %301, %300 : vector<8x128xf32>
    %303 = arith.divf %301, %302 : vector<8x128xf32>
    %304 = math.tanh %298 : vector<8x128xf32>
    %305 = vector.extract_strided_slice %303 {offsets = [0, 0], sizes = [8, 32], strides = [1, 1]} : vector<8x128xf32> to vector<8x32xf32>
    %306 = vector.extract_strided_slice %303 {offsets = [0, 32], sizes = [8, 32], strides = [1, 1]} : vector<8x128xf32> to vector<8x32xf32>
    %307 = vector.extract_strided_slice %304 {offsets = [0, 64], sizes = [8, 32], strides = [1, 1]} : vector<8x128xf32> to vector<8x32xf32>
    %308 = vector.extract_strided_slice %303 {offsets = [0, 96], sizes = [8, 32], strides = [1, 1]} : vector<8x128xf32> to vector<8x32xf32>
    %309 = arith.mulf %306, %293 : vector<8x32xf32>
    %310 = arith.mulf %305, %307 : vector<8x32xf32>
    %311 = arith.addf %309, %310 : vector<8x32xf32>
    %312 = math.tanh %311 : vector<8x32xf32>
    %313 = arith.mulf %308, %312 : vector<8x32xf32>
    %c0_61 = arith.constant 0 : index
    %c0_62 = arith.constant 0 : index
    %314 = vector.load %arg8[%c0_61, %c0_62] : memref<32x16xf32, #tpu.memory_space<vmem>>, vector<32x16xf32>
    %cst_63 = arith.constant dense<0.000000e+00> : vector<8x16xf32>
    %315 = tpu.matmul %313, %314, %cst_63 {dimension_numbers = #tpu.dot_dimension_numbers<[1], [0], [0], [1], [0, 0, 1, 1], [], []>} : vector<8x32xf32>, vector<32x16xf32>, vector<8x16xf32> -> vector<8x16xf32>
    %c0_64 = arith.constant 0 : index
    %c0_65 = arith.constant 0 : index
    %316 = vector.load %arg9[%c0_64, %c0_65] : memref<1x16xf32, #tpu.memory_space<vmem>>, vector<1x16xf32>
    %317 = vector.broadcast %316 : vector<1x16xf32> to vector<8x16xf32>
    %318 = arith.addf %315, %317 : vector<8x16xf32>
    %cst_66 = arith.constant 0.000000e+00 : f32
    %319 = vector.broadcast %cst_66 : f32 to vector<8x16xf32>
    %320 = arith.maximumf %318, %319 : vector<8x16xf32>
    %c0_67 = arith.constant 0 : index
    %c0_68 = arith.constant 0 : index
    %321 = vector.load %arg10[%c0_67, %c0_68] : memref<16x2xf32, #tpu.memory_space<vmem>>, vector<16x2xf32>
    %cst_69 = arith.constant dense<0.000000e+00> : vector<8x2xf32>
    %322 = tpu.matmul %320, %321, %cst_69 {dimension_numbers = #tpu.dot_dimension_numbers<[1], [0], [0], [1], [0, 0, 1, 1], [], []>} : vector<8x16xf32>, vector<16x2xf32>, vector<8x2xf32> -> vector<8x2xf32>
    %c0_70 = arith.constant 0 : index
    %c0_71 = arith.constant 0 : index
    %323 = vector.load %arg11[%c0_70, %c0_71] : memref<1x2xf32, #tpu.memory_space<vmem>>, vector<1x2xf32>
    %324 = vector.broadcast %323 : vector<1x2xf32> to vector<8x2xf32>
    %325 = arith.addf %322, %324 : vector<8x2xf32>
    %cst_72 = arith.constant dense<0xFF800000> : vector<8xf32>
    %326 = vector.multi_reduction <maximumf>, %325, %cst_72 [1] : vector<8x2xf32> to vector<8xf32>
    %327 = vector.shape_cast %326 : vector<8xf32> to vector<8x1xf32>
    %328 = vector.broadcast %327 : vector<8x1xf32> to vector<8x2xf32>
    %329 = arith.subf %325, %328 : vector<8x2xf32>
    %330 = math.exp %329 : vector<8x2xf32>
    %cst_73 = arith.constant dense<0.000000e+00> : vector<8xf32>
    %331 = vector.multi_reduction <add>, %330, %cst_73 [1] : vector<8x2xf32> to vector<8xf32>
    %332 = vector.shape_cast %331 : vector<8xf32> to vector<8x1xf32>
    %333 = vector.broadcast %332 : vector<8x1xf32> to vector<8x2xf32>
    %334 = arith.divf %330, %333 : vector<8x2xf32>
    %c0_74 = arith.constant 0 : index
    %c0_75 = arith.constant 0 : index
    %335 = vector.load %arg12[%c0_74, %c0_75] : memref<8x2xf32, #tpu.memory_space<vmem>>, vector<8x2xf32>
    tpu.vector_store %arg12[%c0_74, %c0_75], %334 {strides = array<i32>} : memref<8x2xf32, #tpu.memory_space<vmem>>, vector<8x2xf32>,
    return
  }
  func.func @transform_0(%arg0: i32) -> (i32, i32) {
    %c0_i32 = arith.constant 0 : i32
    %c0_i32_0 = arith.constant 0 : i32
    %c0_i32_1 = arith.constant 0 : i32
    return %c0_i32, %c0_i32_0 : i32, i32
  }
  func.func @transform_1(%arg0: i32) -> (i32, i32) {
    %c0_i32 = arith.constant 0 : i32
    %c0_i32_0 = arith.constant 0 : i32
    %c0_i32_1 = arith.constant 0 : i32
    return %c0_i32, %c0_i32_0 : i32, i32
  }
  func.func @transform_2(%arg0: i32) -> (i32, i32) {
    %c0_i32 = arith.constant 0 : i32
    %c0_i32_0 = arith.constant 0 : i32
    %c0_i32_1 = arith.constant 0 : i32
    return %c0_i32, %c0_i32_0 : i32, i32
  }
  func.func @transform_3(%arg0: i32) -> (i32, i32) {
    %c0_i32 = arith.constant 0 : i32
    %c0_i32_0 = arith.constant 0 : i32
    %c0_i32_1 = arith.constant 0 : i32
    return %c0_i32, %c0_i32_0 : i32, i32
  }
  func.func @transform_4(%arg0: i32) -> (i32, i32) {
    %c0_i32 = arith.constant 0 : i32
    %c0_i32_0 = arith.constant 0 : i32
    %c0_i32_1 = arith.constant 0 : i32
    return %c0_i32, %c0_i32_0 : i32, i32
  }
  func.func @transform_5(%arg0: i32) -> (i32, i32) {
    %c0_i32 = arith.constant 0 : i32
    %c0_i32_0 = arith.constant 0 : i32
    %c0_i32_1 = arith.constant 0 : i32
    return %c0_i32, %c0_i32_0 : i32, i32
  }
  func.func @transform_6(%arg0: i32) -> (i32, i32) {
    %c0_i32 = arith.constant 0 : i32
    %c0_i32_0 = arith.constant 0 : i32
    %c0_i32_1 = arith.constant 0 : i32
    return %c0_i32, %c0_i32_0 : i32, i32
  }
  func.func @transform_7(%arg0: i32) -> (i32, i32) {
    %c0_i32 = arith.constant 0 : i32
    %c0_i32_0 = arith.constant 0 : i32
    %c0_i32_1 = arith.constant 0 : i32
    return %c0_i32, %c0_i32_0 : i32, i32
  }
  func.func @transform_8(%arg0: i32) -> (i32, i32) {
    %c0_i32 = arith.constant 0 : i32
    %c0_i32_0 = arith.constant 0 : i32
    %c0_i32_1 = arith.constant 0 : i32
    return %c0_i32, %c0_i32_0 : i32, i32
  }
  func.func @transform_9(%arg0: i32) -> (i32, i32) {
    %c0_i32 = arith.constant 0 : i32
    %c0_i32_0 = arith.constant 0 : i32
    %c0_i32_1 = arith.constant 0 : i32
    return %c0_i32, %c0_i32_0 : i32, i32
  }
  func.func @transform_10(%arg0: i32) -> (i32, i32) {
    %c0_i32 = arith.constant 0 : i32
    %c0_i32_0 = arith.constant 0 : i32
    %c0_i32_1 = arith.constant 0 : i32
    return %c0_i32, %c0_i32_0 : i32, i32
  }
  func.func @transform_11(%arg0: i32) -> (i32, i32) {
    %c0_i32 = arith.constant 0 : i32
    %c0_i32_0 = arith.constant 0 : i32
    %c0_i32_1 = arith.constant 0 : i32
    return %c0_i32, %c0_i32_0 : i32, i32
  }
}

</mosaic_0001>

<bundles_post_ra>
// kernel: lstm_model_forward.1
= control target key start
LH: loop header
LB: loop body
LE: loop exit
PB: predicated region body
PF: predicated region fallthrough
CT: control target
= control target key end

     0   :  { %vm59_vm0 = vcmask 130048   ;;  %v2786_v0 = vmov 0.0|0.0   ;;  %vm2787_vm1 = vmmov 0   ;;  %v2788_v4 = vmov 0.0   ;;  %s2789_s14 = smov 64   ;;  %s3227_s1 = inlined_call_operand.vmem [shape: f32[16,128], index: 1, kind: input, shape index: {}]   ;;  %s3228_s2 = inlined_call_operand.vmem [shape: f32[32,128], index: 2, kind: input, shape index: {}]   ;;  %s3229_s0 = inlined_call_operand.vmem [shape: f32[64,16], index: 0, kind: input, shape index: {}]   ;;  %s3230_s3 = inlined_call_operand.vmem [shape: f32[1,128], index: 3, kind: input, shape index: {}]   ;;  %s3231_s4 = inlined_call_operand.vmem [shape: f32[32,128], index: 4, kind: input, shape index: {}]   ;;  %s3232_s5 = inlined_call_operand.vmem [shape: f32[32,128], index: 5, kind: input, shape index: {}]   ;;  %s3233_s6 = inlined_call_operand.vmem [shape: f32[1,128], index: 6, kind: input, shape index: {}]   ;;  %s3234_s7 = inlined_call_operand.vmem [shape: f32[32,16], index: 7, kind: input, shape index: {}]   ;;  %s3235_s9 = inlined_call_operand.vmem [shape: f32[16,2], index: 9, kind: input, shape index: {}]   ;;  %s3236_s8 = inlined_call_operand.vmem [shape: f32[1,16], index: 8, kind: input, shape index: {}]   ;;  %s3237_s10 = inlined_call_operand.vmem [shape: f32[1,2], index: 10, kind: input, shape index: {}]   ;;  %s3238_s11 = inlined_call_operand.vmem [shape: f32[8,2], index: 11, kind: output, shape index: {}]  }
   0x1   :  { %2536 = vmatprep.subr.bf16.mxu1 %v2786_v0  ;;  %v38_v1 = vld [vmem:[%s3227_s1] sm:$0xff]  ;;  %v39_v2 = vld [vmem:[%s3227_s1 + $0x8] sm:$0xff]  ;;  %2326 = vmatprep.mubr.msk.f32.mxu1 %vm2787_vm1, %v2788_v4  ;;  %v42_v9 = vld [vmem:[%s3228_s2 + $0x10] sm:$0xff]  ;;  %vm189_vm2 = vcmask 261120   ;;  %vm2123_vm3 = vcmask 15360  }
   0x2   :  { %v40_v3 = vld [vmem:[%s3228_s2] sm:$0xff]  ;;  %v2532_v5 = vpack.c.bf16 %v39_v2, %v38_v1  ;;  %v41_v6 = vld [vmem:[%s3228_s2 + $0x8] sm:$0xff]  ;;  %v43_v10 = vld [vmem:[%s3228_s2 + $0x18] sm:$0xff] }
   0x3   :  { %v45_v7 = vld [vmem:[%s3229_s0] sm:$0xff]  ;;  %v2869_v8 = vpack.c.bf16 %v41_v6, %v40_v3  ;;  %v46_v11 = vld [vmem:[%s3229_s0 + $0x8] sm:$0xff]  ;;  %v2882_v12 = vpack.c.bf16 %v43_v10, %v42_v9  ;;  %v47_v48 = vld [vmem:[%s3229_s0 + $0x10] sm:$0xff] }
   0x4   :  { %2306 = vmatprep.mubr.msk.f32.mxu0 %vm59_vm0, %v45_v7  ;;  %2533 = vmatprep.subr.bf16.mxu0 %v2532_v5  ;;  %v2903_v13 = vld [vmem:[%s3230_s3] ss:$0 sm:$0xff]  ;;  %s2790_s3 = smov 32   ;;  %v48_v49 = vld [vmem:[%s3229_s0 + $0x18] sm:$0xff]  ;;  %v50_v51 = vld [vmem:[%s3229_s0 + $0x28] sm:$0xff] }
   0x5   :  { %2538 = vmatpush3.bf16.msra.mxu1 %v2869_v8  ;;  %2535 = vmatpush3.bf16.msra.mxu0 %v2532_v5  ;;  %v49_v50 = vld [vmem:[%s3229_s0 + $0x20] sm:$0xff]  ;;  %v51_v52 = vld [vmem:[%s3229_s0 + $0x30] sm:$0xff]  ;;  %v52_v53 = vld [vmem:[%s3229_s0 + $0x38] sm:$0xff] }
   0x6   :  { %2539 = vmatprep.subr.bf16.mxu1 %v2786_v0  ;;  %2548 = vmatprep.subr.bf16.mxu0 %v2786_v0 }
   0x8   :  { %2307 = vmatmul.mubr.msk.f32.vlgmr.msra.gmra.mrb[0].mxu0 %vm59_vm0, %v46_v11 }
   0x9   :  { %2541 = vmatpush3.bf16.msra.mxu1 %v2882_v12  ;;  %2550 = vmatpush3.bf16.msra.mxu0 %v2869_v8 }
   0xa   :  { %2542 = vmatprep.subr.bf16.mxu1 %v2786_v0  ;;  %2551 = vmatprep.subr.bf16.mxu0 %v2786_v0 }
   0xb   :  { %2309 = vmatprep.mubr.msk.f32.mxu0 %vm59_vm0, %v47_v48 }
   0xc   :  { %2327 = vmatmul.mubr.f32.vlgmr.msra.gmra.mrb[0].mxu1 %v2788_v4  ;;  %2310 = vmatmul.mubr.msk.f32.gmra.mrb[2].mxu0 %vm59_vm0, %v48_v49 }
   0xd   :  { %2544 = vmatpush3.bf16.msra.mxu1 %v2869_v8  ;;  %2337 = vmatprep.mubr.msk.f32.mxu1 %vm2787_vm1, %v2788_v4 }
   0xe   :  { %2545 = vmatprep.subr.bf16.mxu1 %v2786_v0  ;;  %2553 = vmatpush3.bf16.msra.mxu0 %v2882_v12 }
   0xf   :  { %2560 = vmatprep.subr.bf16.mxu0 %v2786_v0  ;;  %2312 = vmatprep.mubr.msk.f32.mxu0 %vm59_vm0, %v49_v50 }
  0x10   :  { %2313 = vmatmul.mubr.msk.f32.gmra.mrb[4].mxu0 %vm59_vm0, %v50_v51 }
  0x11   :  { %2547 = vmatpush3.bf16.msra.mxu1 %v2882_v12  ;;  %2315 = vmatprep.mubr.msk.f32.mxu0 %vm59_vm0, %v51_v52 }
  0x12   :  { %2554 = vmatprep.subr.bf16.mxu1 %v2786_v0 }
  0x14   :  { %2316 = vmatmul.mubr.msk.f32.gmra.mrb[6].mxu0 %vm59_vm0, %v52_v53 }
  0x15   :  { %2348 = vmatprep.mubr.msk.f32.mxu0 %vm2787_vm1, %v2788_v4 }
  0xdb   :  { %v2308_v14 = vpop.f32.mrb[0].mxu0 }
  0xdc   :  { %v150_v15 = vpop.f32.mrb[1].mxu0  ;;  %v156_v34 = vadd.f32 %v2308_v14, %v2903_v13 }
  0xdd   :  { %v151_v16 = vadd.f32 %v2903_v13, %v150_v15 }
  0xdf   :  { %v259_v17 = vpop.f32.mrb[0].mxu1  ;;  %v2311_v57 = vpop.f32.mrb[2].mxu0 }
  0xe0   :  { %v263_v18 = vadd.f32 %v259_v17, %v151_v16  ;;  %v2328_v19 = vpop.f32.mrb[1].mxu1  ;;  %v160_v58 = vpop.f32.mrb[3].mxu0 }
  0xe1   :  { %v161_v1 = vadd.f32 %v2903_v13, %v160_v58 }
  0xe2   :  { %2654 = vtanh.f32 %v263_v18  ;;  %v2149_v21 = vmul.f32 -1.442695, %v263_v18 }
  0xe3   :  { %v2949_v59 = vpop.f32.mrb[4].mxu0 }
  0xe4   :  { %2656 = vpow2.f32 %v2149_v21  ;;  %v2951_v60 = vpop.f32.mrb[5].mxu0 }
  0xe7   :  { %v2953_v61 = vpop.f32.mrb[6].mxu0 }
  0xe8   :  { %v2955_v62 = vpop.f32.mrb[7].mxu0 }
  0xec   :  { %v2655_v20 = vpop.eup %2654 }
  0xed   :  { %273 = vrot.lane.b32.xlu0 %v2655_v20, %s2789_s14 }
  0xee   :  { %v2657_v22 = vpop.eup %2656 }
  0xef   :  { %v267_v23 = vadd.f32 1.0, %v2657_v22 }
  0xf1   :  { %2658 = vrcp.f32 %v267_v23  ;;  %v166_v23 = vadd.f32 %v2311_v57, %v2903_v13 }
  0xfb   :  { %v2659_v24 = vpop.eup %2658 }
  0xfc   :  { %v271_v27 = vmul.f32 0.0, %v2659_v24 }
 0x15f   :  { %v274_v25 = vpop.permute.xlu0 %273 }
 0x160   :  { %v276_v26 = vmul.f32 %v2659_v24, %v274_v25 }
 0x162   :  { %278 = vrot.lane.b32.xlu0 %v276_v26, %s2790_s3 }
 0x1d4   :  { %v279_v28 = vpop.permute.xlu0 %278 }
 0x1d5   :  { %v281_v29 = vadd.f32 %v279_v28, %v271_v27 }
 0x1d7   :  { %2660 = vtanh.f32 %v281_v29 }
 0x1e1   :  { %v2661_v30 = vpop.eup %2660 }
 0x1e2   :  { %284 = vrot.lane.b32.xlu1 %v2661_v30, %s2789_s14 }
 0x254   :  { %v285_v31 = vpop.permute.xlu1 %284 }
 0x255   :  { %v287_v32 = vmul.f32 %v2659_v24, %v285_v31 }
 0x257   :  { %289 = vrot.lane.b32.xlu1 %v287_v32, %s2790_s3 }
 0x2c9   :  { %v290_v33 = vpop.permute.xlu1 %289 }
 0x2ca   :  { %292 = vst.msk [vmem:[#allocation2] sm:$0xff] %vm189_vm2, %v290_v33  ;;  %2338 = vmatmul.mubr.msk.f32.vlgmr.msra.gmra.mrb[2].mxu1 %vm189_vm2, %v290_v33 }
 0x2cb   :  { %2556 = vmatpush3.bf16.msra.mxu1 %v2869_v8  ;;  %2359 = vmatprep.mubr.msk.f32.mxu1 %vm2787_vm1, %v2788_v4 }
 0x2cc   :  { %2557 = vmatprep.subr.bf16.mxu1 %v2786_v0 }
 0x2cf   :  { %2559 = vmatpush3.bf16.msra.mxu1 %v2882_v12 }
 0x2d0   :  { %2566 = vmatprep.subr.bf16.mxu1 %v2786_v0 }
 0x39d   :  { %v361_v35 = vpop.f32.mrb[2].mxu1 }
 0x39e   :  { %v365_v36 = vadd.f32 %v361_v35, %v156_v34  ;;  %v2339_v37 = vpop.f32.mrb[3].mxu1 }
 0x3a0   :  { %2662 = vtanh.f32 %v365_v36  ;;  %v2151_v39 = vmul.f32 -1.442695, %v365_v36 }
 0x3a2   :  { %2664 = vpow2.f32 %v2151_v39 }
 0x3aa   :  { %v2663_v38 = vpop.eup %2662 }
 0x3ab   :  { %375 = vrot.lane.b32.xlu0 %v2663_v38, %s2789_s14 }
 0x3ac   :  { %v2665_v40 = vpop.eup %2664 }
 0x3ad   :  { %v369_v41 = vadd.f32 1.0, %v2665_v40 }
 0x3af   :  { %2666 = vrcp.f32 %v369_v41  ;;  %v171_v41 = vadd.f32 %v2903_v13, %v2951_v60  ;;  %v176_v60 = vadd.f32 %v2949_v59, %v2903_v13 }
 0x3b9   :  { %v2667_v42 = vpop.eup %2666 }
 0x3ba   :  { %v373_v45 = vmul.f32 %v2667_v42, %v281_v29 }
 0x41d   :  { %v376_v43 = vpop.permute.xlu0 %375 }
 0x41e   :  { %v378_v44 = vmul.f32 %v2667_v42, %v376_v43 }
 0x420   :  { %380 = vrot.lane.b32.xlu1 %v378_v44, %s2790_s3 }
 0x492   :  { %v381_v46 = vpop.permute.xlu1 %380 }
 0x493   :  { %v383_v47 = vadd.f32 %v381_v46, %v373_v45 }
 0x495   :  { %2668 = vtanh.f32 %v383_v47 }
 0x49f   :  { %v2669_v54 = vpop.eup %2668 }
 0x4a0   :  { %386 = vrot.lane.b32.xlu0 %v2669_v54, %s2789_s14 }
 0x512   :  { %v387_v55 = vpop.permute.xlu0 %386 }
 0x513   :  { %v389_v56 = vmul.f32 %v2667_v42, %v387_v55 }
 0x515   :  { %391 = vrot.lane.b32.xlu1 %v389_v56, %s2790_s3 }
 0x587   :  { %v392_v63 = vpop.permute.xlu1 %391 }
 0x588   :  { %394 = vst.msk [vmem:[#allocation2 + $0x8] sm:$0xff] %vm189_vm2, %v392_v63  ;;  %2349 = vmatmul.mubr.msk.f32.vlgmr.msra.gmra.mrb[8].mxu0 %vm189_vm2, %v392_v63 }
 0x589   :  { %2562 = vmatpush3.bf16.msra.mxu0 %v2869_v8  ;;  %2370 = vmatprep.mubr.msk.f32.mxu0 %vm2787_vm1, %v2788_v4 }
 0x58a   :  { %2563 = vmatprep.subr.bf16.mxu0 %v2786_v0 }
 0x58d   :  { %2565 = vmatpush3.bf16.msra.mxu0 %v2882_v12 }
 0x58e   :  { %2572 = vmatprep.subr.bf16.mxu0 %v2786_v0 }
 0x65b   :  { %v463_v2 = vpop.f32.mrb[8].mxu0 }
 0x65c   :  { %v467_v3 = vadd.f32 %v463_v2, %v161_v1  ;;  %v2350_v5 = vpop.f32.mrb[9].mxu0 }
 0x65e   :  { %2670 = vtanh.f32 %v467_v3  ;;  %v2153_v7 = vmul.f32 -1.442695, %v467_v3 }
 0x660   :  { %2672 = vpow2.f32 %v2153_v7 }
 0x668   :  { %v2671_v6 = vpop.eup %2670 }
 0x669   :  { %477 = vrot.lane.b32.xlu0 %v2671_v6, %s2789_s14 }
 0x66a   :  { %v2673_v9 = vpop.eup %2672 }
 0x66b   :  { %v471_v10 = vadd.f32 1.0, %v2673_v9 }
 0x66d   :  { %2674 = vrcp.f32 %v471_v10 }
 0x677   :  { %v2675_v11 = vpop.eup %2674 }
 0x678   :  { %v475_v16 = vmul.f32 %v2675_v11, %v383_v47 }
 0x6db   :  { %v478_v14 = vpop.permute.xlu0 %477 }
 0x6dc   :  { %v480_v15 = vmul.f32 %v2675_v11, %v478_v14  ;;  %v1007_v14 = vld [vmem:[%s3231_s4] sm:$0xff] }
 0x6de   :  { %482 = vrot.lane.b32.xlu1 %v480_v15, %s2790_s3  ;;  %v1008_v15 = vld [vmem:[%s3231_s4 + $0x8] sm:$0xff] }
 0x750   :  { %v483_v17 = vpop.permute.xlu1 %482 }
 0x751   :  { %v485_v18 = vadd.f32 %v483_v17, %v475_v16  ;;  %v2584_v16 = vpack.c.bf16 %v1008_v15, %v1007_v14 }
 0x753   :  { %2676 = vtanh.f32 %v485_v18 }
 0x75d   :  { %v2677_v19 = vpop.eup %2676 }
 0x75e   :  { %488 = vrot.lane.b32.xlu0 %v2677_v19, %s2789_s14 }
 0x7d0   :  { %v489_v20 = vpop.permute.xlu0 %488 }
 0x7d1   :  { %v491_v21 = vmul.f32 %v2675_v11, %v489_v20  ;;  %v1009_v20 = vld [vmem:[%s3231_s4 + $0x10] sm:$0xff] }
 0x7d3   :  { %493 = vrot.lane.b32.xlu1 %v491_v21, %s2790_s3  ;;  %v1010_v21 = vld [vmem:[%s3231_s4 + $0x18] sm:$0xff] }
 0x845   :  { %v494_v22 = vpop.permute.xlu1 %493 }
 0x846   :  { %496 = vst.msk [vmem:[#allocation2 + $0x10] sm:$0xff] %vm189_vm2, %v494_v22  ;;  %2360 = vmatmul.mubr.msk.f32.vlgmr.msra.gmra.mrb[4].mxu1 %vm189_vm2, %v494_v22  ;;  %v2588_v22 = vpack.c.bf16 %v1010_v21, %v1009_v20 }
 0x847   :  { %2568 = vmatpush3.bf16.msra.mxu1 %v2869_v8  ;;  %2381 = vmatprep.mubr.msk.f32.mxu1 %vm2787_vm1, %v2788_v4 }
 0x848   :  { %2569 = vmatprep.subr.bf16.mxu1 %v2786_v0 }
 0x84b   :  { %2571 = vmatpush3.bf16.msra.mxu1 %v2882_v12 }
 0x84c   :  { %2578 = vmatprep.subr.bf16.mxu1 %v2786_v0 }
 0x919   :  { %v565_v24 = vpop.f32.mrb[4].mxu1 }
 0x91a   :  { %v569_v25 = vadd.f32 %v565_v24, %v166_v23  ;;  %v2361_v26 = vpop.f32.mrb[5].mxu1  ;;  %v1016_v24 = vld [vmem:[#allocation2] sm:$0xff] }
 0x91b   :  { %v1018_v26 = vld [vmem:[#allocation2 + $0x10] sm:$0xff] }
 0x91c   :  { %2678 = vtanh.f32 %v569_v25  ;;  %v2155_v28 = vmul.f32 -1.442695, %v569_v25  ;;  %v1017_v25 = vld [vmem:[#allocation2 + $0x8] sm:$0xff] }
 0x91e   :  { %2680 = vpow2.f32 %v2155_v28 }
 0x926   :  { %v2679_v27 = vpop.eup %2678 }
 0x927   :  { %579 = vrot.lane.b32.xlu0 %v2679_v27, %s2789_s14 }
 0x928   :  { %v2681_v29 = vpop.eup %2680 }
 0x929   :  { %v573_v30 = vadd.f32 1.0, %v2681_v29 }
 0x92b   :  { %2682 = vrcp.f32 %v573_v30  ;;  %v181_v30 = vadd.f32 %v2903_v13, %v2955_v62 }
 0x935   :  { %v2683_v31 = vpop.eup %2682 }
 0x936   :  { %v577_v34 = vmul.f32 %v2683_v31, %v485_v18 }
 0x999   :  { %v580_v32 = vpop.permute.xlu0 %579 }
 0x99a   :  { %v582_v33 = vmul.f32 %v2683_v31, %v580_v32 }
 0x99c   :  { %584 = vrot.lane.b32.xlu1 %v582_v33, %s2790_s3 }
 0xa0e   :  { %v585_v35 = vpop.permute.xlu1 %584 }
 0xa0f   :  { %v587_v36 = vadd.f32 %v585_v35, %v577_v34 }
 0xa11   :  { %2684 = vtanh.f32 %v587_v36 }
 0xa1b   :  { %v2685_v37 = vpop.eup %2684 }
 0xa1c   :  { %590 = vrot.lane.b32.xlu0 %v2685_v37, %s2789_s14 }
 0xa8e   :  { %v591_v38 = vpop.permute.xlu0 %590 }
 0xa8f   :  { %v593_v39 = vmul.f32 %v2683_v31, %v591_v38 }
 0xa91   :  { %595 = vrot.lane.b32.xlu1 %v593_v39, %s2790_s3 }
 0xb03   :  { %v596_v40 = vpop.permute.xlu1 %595 }
 0xb04   :  { %598 = vst.msk [vmem:[#allocation2 + $0x18] sm:$0xff] %vm189_vm2, %v596_v40  ;;  %2371 = vmatmul.mubr.msk.f32.vlgmr.msra.gmra.mrb[10].mxu0 %vm189_vm2, %v596_v40 }
 0xb05   :  { %2574 = vmatpush3.bf16.msra.mxu0 %v2869_v8  ;;  %2392 = vmatprep.mubr.msk.f32.mxu0 %vm2787_vm1, %v2788_v4 }
 0xb06   :  { %2575 = vmatprep.subr.bf16.mxu0 %v2786_v0 }
 0xb09   :  { %2577 = vmatpush3.bf16.msra.mxu0 %v2882_v12 }
 0xb0a   :  { %2585 = vmatprep.subr.bf16.mxu0 %v2584_v16 }
 0xb0b   :  { %v1019_v27 = vld [vmem:[#allocation2 + $0x18] sm:$0xff] }
 0xbd7   :  { %v667_v42 = vpop.f32.mrb[10].mxu0 }
 0xbd8   :  { %v671_v43 = vadd.f32 %v667_v42, %v171_v41  ;;  %v2372_v44 = vpop.f32.mrb[11].mxu0 }
 0xbda   :  { %2686 = vtanh.f32 %v671_v43  ;;  %v2157_v46 = vmul.f32 -1.442695, %v671_v43 }
 0xbdc   :  { %2688 = vpow2.f32 %v2157_v46 }
 0xbe4   :  { %v2687_v45 = vpop.eup %2686 }
 0xbe5   :  { %681 = vrot.lane.b32.xlu0 %v2687_v45, %s2789_s14 }
 0xbe6   :  { %v2689_v47 = vpop.eup %2688 }
 0xbe7   :  { %v675_v48 = vadd.f32 1.0, %v2689_v47 }
 0xbe9   :  { %2690 = vrcp.f32 %v675_v48 }
 0xbf3   :  { %v2691_v49 = vpop.eup %2690 }
 0xbf4   :  { %v679_v52 = vmul.f32 %v2691_v49, %v587_v36 }
 0xc57   :  { %v682_v50 = vpop.permute.xlu0 %681 }
 0xc58   :  { %v684_v51 = vmul.f32 %v2691_v49, %v682_v50  ;;  %v1011_v50 = vld [vmem:[%s3232_s5] sm:$0xff] }
 0xc5a   :  { %686 = vrot.lane.b32.xlu1 %v684_v51, %s2790_s3  ;;  %v1012_v51 = vld [vmem:[%s3232_s5 + $0x8] sm:$0xff] }
 0xccc   :  { %v687_v53 = vpop.permute.xlu1 %686 }
 0xccd   :  { %v689_v54 = vadd.f32 %v687_v53, %v679_v52  ;;  %v3055_v52 = vpack.c.bf16 %v1012_v51, %v1011_v50  ;;  %v1013_v53 = vld [vmem:[%s3232_s5 + $0x10] sm:$0xff] }
 0xccf   :  { %2692 = vtanh.f32 %v689_v54 }
 0xcd9   :  { %v2693_v55 = vpop.eup %2692 }
 0xcda   :  { %692 = vrot.lane.b32.xlu0 %v2693_v55, %s2789_s14 }
 0xd4c   :  { %v693_v56 = vpop.permute.xlu0 %692 }
 0xd4d   :  { %v695_v57 = vmul.f32 %v2691_v49, %v693_v56 }
 0xd4f   :  { %697 = vrot.lane.b32.xlu1 %v695_v57, %s2790_s3 }
 0xdc1   :  { %v698_v58 = vpop.permute.xlu1 %697 }
 0xdc2   :  { %700 = vst.msk [vmem:[#allocation2 + $0x20] sm:$0xff] %vm189_vm2, %v698_v58  ;;  %2382 = vmatmul.mubr.msk.f32.vlgmr.msra.gmra.mrb[6].mxu1 %vm189_vm2, %v698_v58 }
 0xdc3   :  { %2580 = vmatpush3.bf16.msra.mxu1 %v2869_v8  ;;  %2403 = vmatprep.mubr.msk.f32.mxu1 %vm2787_vm1, %v2788_v4 }
 0xdc4   :  { %2581 = vmatprep.subr.bf16.mxu1 %v2786_v0 }
 0xdc7   :  { %2583 = vmatpush3.bf16.msra.mxu1 %v2882_v12 }
 0xdc8   :  { %2592 = vmatprep.subr.bf16.mxu1 %v2786_v0 }
 0xdc9   :  { %v1020_v28 = vld [vmem:[#allocation2 + $0x20] sm:$0xff] }
 0xe95   :  { %v769_v63 = vpop.f32.mrb[6].mxu1 }
 0xe96   :  { %v773_v1 = vadd.f32 %v769_v63, %v176_v60  ;;  %v2383_v2 = vpop.f32.mrb[7].mxu1  ;;  %v186_v63 = vadd.f32 %v2953_v61, %v2903_v13 }
 0xe98   :  { %2694 = vtanh.f32 %v773_v1  ;;  %v2159_v8 = vmul.f32 -1.442695, %v773_v1 }
 0xe9a   :  { %2696 = vpow2.f32 %v2159_v8  ;;  %v3091_v8 = vld [vmem:[%s3233_s6] ss:$0 sm:$0xff] }
 0xea2   :  { %v2695_v3 = vpop.eup %2694 }
 0xea3   :  { %783 = vrot.lane.b32.xlu0 %v2695_v3, %s2789_s14 }
 0xea4   :  { %v2697_v5 = vpop.eup %2696 }
 0xea5   :  { %v777_v6 = vadd.f32 1.0, %v2697_v5 }
 0xea7   :  { %2698 = vrcp.f32 %v777_v6 }
 0xeb1   :  { %v2699_v7 = vpop.eup %2698 }
 0xeb2   :  { %v781_v10 = vmul.f32 %v2699_v7, %v689_v54  ;;  %v1014_v54 = vld [vmem:[%s3232_s5 + $0x18] sm:$0xff] }
 0xeb3   :  { %v3065_v55 = vpack.c.bf16 %v1014_v54, %v1013_v53 }
 0xf15   :  { %v784_v9 = vpop.permute.xlu0 %783 }
 0xf16   :  { %v786_v12 = vmul.f32 %v2699_v7, %v784_v9 }
 0xf18   :  { %788 = vrot.lane.b32.xlu1 %v786_v12, %s2790_s3 }
 0xf8a   :  { %v789_v11 = vpop.permute.xlu1 %788 }
 0xf8b   :  { %v791_v59 = vadd.f32 %v789_v11, %v781_v10 }
 0xf8d   :  { %2700 = vtanh.f32 %v791_v59 }
 0xf97   :  { %v2701_v17 = vpop.eup %2700 }
 0xf98   :  { %794 = vrot.lane.b32.xlu0 %v2701_v17, %s2789_s14 }
0x100a   :  { %v795_v18 = vpop.permute.xlu0 %794 }
0x100b   :  { %v797_v19 = vmul.f32 %v2699_v7, %v795_v18 }
0x100d   :  { %799 = vrot.lane.b32.xlu1 %v797_v19, %s2790_s3 }
0x107f   :  { %v800_v23 = vpop.permute.xlu1 %799 }
0x1080   :  { %802 = vst.msk [vmem:[#allocation2 + $0x28] sm:$0xff] %vm189_vm2, %v800_v23  ;;  %2393 = vmatmul.mubr.msk.f32.vlgmr.msra.gmra.mrb[12].mxu0 %vm189_vm2, %v800_v23 }
0x1081   :  { %2587 = vmatpush3.bf16.msra.mxu0 %v2584_v16  ;;  %2414 = vmatprep.mubr.msk.f32.mxu0 %vm189_vm2, %v1016_v24 }
0x1082   :  { %2589 = vmatprep.subr.bf16.mxu0 %v2588_v22 }
0x1085   :  { %2591 = vmatpush3.bf16.msra.mxu0 %v2588_v22 }
0x1086   :  { %2604 = vmatprep.subr.bf16.mxu0 %v2786_v0 }
0x1087   :  { %v1021_v29 = vld [vmem:[#allocation2 + $0x28] sm:$0xff] }
0x1088   :  { %2415 = vmatmul.mubr.msk.f32.vlgmr.msra.gmra.mrb[14].mxu0 %vm189_vm2, %v1017_v25 }
0x1089   :  { %2417 = vmatprep.mubr.msk.f32.mxu0 %vm189_vm2, %v1018_v26  ;;  %2606 = vmatpush3.bf16.msra.mxu0 %v3055_v52 }
0x108a   :  { %2607 = vmatprep.subr.bf16.mxu0 %v2786_v0 }
0x108c   :  { %2418 = vmatmul.mubr.msk.f32.gmra.mrb[16].mxu0 %vm189_vm2, %v1019_v27 }
0x108d   :  { %2420 = vmatprep.mubr.msk.f32.mxu0 %vm189_vm2, %v1020_v28  ;;  %2609 = vmatpush3.bf16.msra.mxu0 %v3065_v55 }
0x108e   :  { %2616 = vmatprep.subr.bf16.mxu0 %v2786_v0 }
0x1090   :  { %2421 = vmatmul.mubr.msk.f32.gmra.mrb[18].mxu0 %vm189_vm2, %v1021_v29 }
0x1153   :  { %v871_v31 = vpop.f32.mrb[12].mxu0 }
0x1154   :  { %v875_v32 = vadd.f32 %v871_v31, %v181_v30  ;;  %v2394_v33 = vpop.f32.mrb[13].mxu0 }
0x1156   :  { %2702 = vtanh.f32 %v875_v32  ;;  %v2161_v41 = vmul.f32 -1.442695, %v875_v32 }
0x1158   :  { %2704 = vpow2.f32 %v2161_v41 }
0x115b   :  { %v3033_v34 = vpop.f32.mrb[14].mxu0 }
0x115c   :  { %v1120_v35 = vpop.f32.mrb[15].mxu0 }
0x115d   :  { %v1121_v5 = vadd.f32 %v3091_v8, %v1120_v35 }
0x115f   :  { %v3035_v36 = vpop.f32.mrb[16].mxu0 }
0x1160   :  { %v2703_v37 = vpop.eup %2702  ;;  %v3037_v38 = vpop.f32.mrb[17].mxu0 }
0x1161   :  { %885 = vrot.lane.b32.xlu0 %v2703_v37, %s2789_s14  ;;  %v1126_v37 = vadd.f32 %v3033_v34, %v3091_v8 }
0x1162   :  { %v2705_v62 = vpop.eup %2704 }
0x1163   :  { %v3040_v39 = vpop.f32.mrb[18].mxu0  ;;  %v879_v42 = vadd.f32 1.0, %v2705_v62 }
0x1164   :  { %v3042_v40 = vpop.f32.mrb[19].mxu0 }
0x1165   :  { %2706 = vrcp.f32 %v879_v42 }
0x116f   :  { %v2707_v43 = vpop.eup %2706 }
0x1170   :  { %v883_v46 = vmul.f32 %v2707_v43, %v791_v59 }
0x11d3   :  { %v886_v44 = vpop.permute.xlu0 %885 }
0x11d4   :  { %v888_v45 = vmul.f32 %v2707_v43, %v886_v44 }
0x11d6   :  { %890 = vrot.lane.b32.xlu1 %v888_v45, %s2790_s3 }
0x1248   :  { %v891_v47 = vpop.permute.xlu1 %890 }
0x1249   :  { %v3045_v48 = vadd.f32 %v891_v47, %v883_v46 }
0x124b   :  { %2708 = vtanh.f32 %v3045_v48 }
0x1255   :  { %v2709_v49 = vpop.eup %2708 }
0x1256   :  { %896 = vrot.lane.b32.xlu0 %v2709_v49, %s2789_s14 }
0x12c8   :  { %v897_v56 = vpop.permute.xlu0 %896 }
0x12c9   :  { %v899_v57 = vmul.f32 %v2707_v43, %v897_v56 }
0x12cb   :  { %901 = vrot.lane.b32.xlu1 %v899_v57, %s2790_s3 }
0x133d   :  { %v902_v58 = vpop.permute.xlu1 %901 }
0x133e   :  { %904 = vst.msk [vmem:[#allocation2 + $0x30] sm:$0xff] %vm189_vm2, %v902_v58  ;;  %2404 = vmatmul.mubr.msk.f32.vlgmr.msra.gmra.mrb[8].mxu1 %vm189_vm2, %v902_v58 }
0x133f   :  { %2594 = vmatpush3.bf16.msra.mxu1 %v3055_v52  ;;  %2434 = vmatprep.mubr.msk.f32.mxu1 %vm2787_vm1, %v2788_v4 }
0x1340   :  { %2595 = vmatprep.subr.bf16.mxu1 %v2786_v0 }
0x1343   :  { %2597 = vmatpush3.bf16.msra.mxu1 %v3065_v55 }
0x1344   :  { %2598 = vmatprep.subr.bf16.mxu1 %v2786_v0 }
0x1345   :  { %v1022_v60 = vld [vmem:[#allocation2 + $0x30] sm:$0xff] }
0x1346   :  { %2435 = vmatmul.mubr.f32.vlgmr.msra.gmra.mrb[10].mxu1 %v2788_v4  ;;  %2423 = vmatprep.mubr.msk.f32.mxu0 %vm189_vm2, %v1022_v60 }
0x1347   :  { %2600 = vmatpush3.bf16.msra.mxu1 %v3055_v52  ;;  %2445 = vmatprep.mubr.msk.f32.mxu1 %vm2787_vm1, %v2788_v4 }
0x1348   :  { %2601 = vmatprep.subr.bf16.mxu1 %v2786_v0 }
0x134b   :  { %2603 = vmatpush3.bf16.msra.mxu1 %v3065_v55 }
0x134c   :  { %2610 = vmatprep.subr.bf16.mxu1 %v2786_v0 }
0x1411   :  { %v973_v1 = vpop.f32.mrb[8].mxu1 }
0x1412   :  { %v977_v2 = vadd.f32 %v973_v1, %v186_v63  ;;  %v2405_v3 = vpop.f32.mrb[9].mxu1 }
0x1414   :  { %v2163_v20 = vmul.f32 -1.442695, %v977_v2 }
0x1419   :  { %v1225_v6 = vpop.f32.mrb[10].mxu1 }
0x141a   :  { %v1229_v7 = vadd.f32 %v1225_v6, %v1121_v5  ;;  %v2436_v9 = vpop.f32.mrb[11].mxu1 }
0x141c   :  { %2710 = vtanh.f32 %v1229_v7  ;;  %v2173_v10 = vmul.f32 -1.442695, %v1229_v7 }
0x141e   :  { %2712 = vpow2.f32 %v2173_v10 }
0x1426   :  { %v2711_v12 = vpop.eup %2710 }
0x1427   :  { %1239 = vrot.lane.b32.xlu0 %v2711_v12, %s2789_s14 }
0x1428   :  { %v2713_v13 = vpop.eup %2712 }
0x1429   :  { %v1233_v61 = vadd.f32 1.0, %v2713_v13 }
0x142b   :  { %2714 = vrcp.f32 %v1233_v61 }
0x1435   :  { %v2715_v11 = vpop.eup %2714 }
0x1436   :  { %v1237_v15 = vmul.f32 0.0, %v2715_v11 }
0x1499   :  { %v1240_v59 = vpop.permute.xlu0 %1239 }
0x149a   :  { %v1242_v14 = vmul.f32 %v2715_v11, %v1240_v59 }
0x149c   :  { %1244 = vrot.lane.b32.xlu1 %v1242_v14, %s2790_s3 }
0x150e   :  { %v1245_v16 = vpop.permute.xlu1 %1244 }
0x150f   :  { %v1247_v17 = vadd.f32 %v1245_v16, %v1237_v15 }
0x1511   :  { %2716 = vtanh.f32 %v1247_v17 }
0x1512   :  { %2718 = vtanh.f32 %v977_v2  ;;  %v1131_v2 = vadd.f32 %v3091_v8, %v3037_v38 }
0x1513   :  { %2720 = vpow2.f32 %v2163_v20 }
0x151b   :  { %v2717_v18 = vpop.eup %2716 }
0x151c   :  { %1250 = vrot.lane.b32.xlu0 %v2717_v18, %s2789_s14  ;;  %v2719_v19 = vpop.eup %2718 }
0x151d   :  { %v2721_v21 = vpop.eup %2720 }
0x151e   :  { %v981_v22 = vadd.f32 1.0, %v2721_v21 }
0x1520   :  { %987 = vrot.lane.b32.xlu0 %v2719_v19, %s2789_s14  ;;  %2722 = vrcp.f32 %v981_v22  ;;  %v1136_v19 = vadd.f32 %v3035_v36, %v3091_v8 }
0x152a   :  { %v2723_v25 = vpop.eup %2722 }
0x152b   :  { %v985_v29 = vmul.f32 %v2723_v25, %v3045_v48 }
0x158e   :  { %v1251_v23 = vpop.permute.xlu0 %1250 }
0x158f   :  { %v1253_v24 = vmul.f32 %v2715_v11, %v1251_v23 }
0x1591   :  { %1255 = vrot.lane.b32.xlu1 %v1253_v24, %s2790_s3 }
0x1592   :  { %v988_v26 = vpop.permute.xlu0 %987 }
0x1593   :  { %v990_v27 = vmul.f32 %v2723_v25, %v988_v26 }
0x1595   :  { %992 = vrot.lane.b32.xlu0 %v990_v27, %s2790_s3 }
0x1603   :  { %v1256_v28 = vpop.permute.xlu1 %1255 }
0x1604   :  { %2446 = vmatmul.mubr.msk.f32.vlgmr.msra.gmra.mrb[12].mxu1 %vm189_vm2, %v1256_v28 }
0x1605   :  { %2612 = vmatpush3.bf16.msra.mxu1 %v3055_v52  ;;  %2467 = vmatprep.mubr.msk.f32.mxu1 %vm2787_vm1, %v2788_v4 }
0x1606   :  { %2613 = vmatprep.subr.bf16.mxu1 %v2786_v0 }
0x1607   :  { %v993_v30 = vpop.permute.xlu0 %992 }
0x1608   :  { %v995_v31 = vadd.f32 %v993_v30, %v985_v29 }
0x1609   :  { %2615 = vmatpush3.bf16.msra.mxu1 %v3065_v55 }
0x160a   :  { %2724 = vtanh.f32 %v995_v31  ;;  %2622 = vmatprep.subr.bf16.mxu1 %v2786_v0 }
0x1614   :  { %v2725_v32 = vpop.eup %2724 }
0x1615   :  { %998 = vrot.lane.b32.xlu0 %v2725_v32, %s2789_s14 }
0x1687   :  { %v999_v33 = vpop.permute.xlu0 %998 }
0x1688   :  { %v1001_v35 = vmul.f32 %v2723_v25, %v999_v33 }
0x168a   :  { %1003 = vrot.lane.b32.xlu0 %v1001_v35, %s2790_s3 }
0x16d7   :  { %v1325_v41 = vpop.f32.mrb[12].mxu1 }
0x16d8   :  { %v1329_v62 = vadd.f32 %v1325_v41, %v1126_v37  ;;  %v2447_v42 = vpop.f32.mrb[13].mxu1  ;;  %v1141_v41 = vadd.f32 %v3091_v8, %v3042_v40 }
0x16da   :  { %2726 = vtanh.f32 %v1329_v62  ;;  %v2175_v46 = vmul.f32 -1.442695, %v1329_v62 }
0x16dc   :  { %2728 = vpow2.f32 %v2175_v46 }
0x16e4   :  { %v2727_v43 = vpop.eup %2726 }
0x16e5   :  { %1339 = vrot.lane.b32.xlu1 %v2727_v43, %s2789_s14 }
0x16e6   :  { %v2729_v47 = vpop.eup %2728 }
0x16e7   :  { %v1333_v34 = vadd.f32 1.0, %v2729_v47 }
0x16e9   :  { %2730 = vrcp.f32 %v1333_v34 }
0x16f3   :  { %v2731_v48 = vpop.eup %2730 }
0x16f4   :  { %v1337_v51 = vmul.f32 %v2731_v48, %v1247_v17 }
0x16fc   :  { %v1004_v44 = vpop.permute.xlu0 %1003 }
0x16fd   :  { %1006 = vst.msk [vmem:[#allocation2 + $0x38] sm:$0xff] %vm189_vm2, %v1004_v44 }
0x1704   :  { %v1023_v45 = vld [vmem:[#allocation2 + $0x38] sm:$0xff] }
0x1705   :  { %2424 = vmatmul.mubr.msk.f32.gmra.mrb[20].mxu0 %vm189_vm2, %v1023_v45 }
0x1706   :  { %2456 = vmatprep.mubr.msk.f32.mxu0 %vm2787_vm1, %v2788_v4 }
0x1757   :  { %v1340_v49 = vpop.permute.xlu1 %1339 }
0x1758   :  { %v1342_v50 = vmul.f32 %v2731_v48, %v1340_v49 }
0x175a   :  { %1344 = vrot.lane.b32.xlu1 %v1342_v50, %s2790_s3 }
0x17cc   :  { %v1345_v53 = vpop.permute.xlu1 %1344 }
0x17cd   :  { %v1347_v54 = vadd.f32 %v1345_v53, %v1337_v51 }
0x17cf   :  { %2732 = vtanh.f32 %v1347_v54 }
0x17d8   :  { %v3118_v56 = vpop.f32.mrb[20].mxu0 }
0x17d9   :  { %v2733_v57 = vpop.eup %2732  ;;  %v3120_v58 = vpop.f32.mrb[21].mxu0 }
0x17da   :  { %1350 = vrot.lane.b32.xlu1 %v2733_v57, %s2789_s14 }
0x184c   :  { %v1351_v60 = vpop.permute.xlu1 %1350 }
0x184d   :  { %v1353_v63 = vmul.f32 %v2731_v48, %v1351_v60 }
0x184f   :  { %1355 = vrot.lane.b32.xlu1 %v1353_v63, %s2790_s3  ;;  %v1146_v63 = vadd.f32 %v3040_v39, %v3091_v8 }
0x18c1   :  { %v1356_v1 = vpop.permute.xlu1 %1355 }
0x18c2   :  { %2457 = vmatmul.mubr.msk.f32.vlgmr.msra.gmra.mrb[22].mxu0 %vm189_vm2, %v1356_v1 }
0x18c3   :  { %2618 = vmatpush3.bf16.msra.mxu0 %v3055_v52  ;;  %2478 = vmatprep.mubr.msk.f32.mxu0 %vm2787_vm1, %v2788_v4 }
0x18c4   :  { %2619 = vmatprep.subr.bf16.mxu0 %v2786_v0 }
0x18c7   :  { %2621 = vmatpush3.bf16.msra.mxu0 %v3065_v55 }
0x18c8   :  { %2628 = vmatprep.subr.bf16.mxu0 %v2786_v0 }
0x1995   :  { %v1425_v3 = vpop.f32.mrb[22].mxu0 }
0x1996   :  { %v1429_v5 = vadd.f32 %v1425_v3, %v1131_v2  ;;  %v2458_v6 = vpop.f32.mrb[23].mxu0 }
0x1998   :  { %2734 = vtanh.f32 %v1429_v5  ;;  %v2177_v9 = vmul.f32 -1.442695, %v1429_v5 }
0x199a   :  { %2736 = vpow2.f32 %v2177_v9 }
0x19a2   :  { %v2735_v7 = vpop.eup %2734 }
0x19a3   :  { %1439 = vrot.lane.b32.xlu0 %v2735_v7, %s2789_s14 }
0x19a4   :  { %v2737_v12 = vpop.eup %2736 }
0x19a5   :  { %v1433_v10 = vadd.f32 1.0, %v2737_v12 }
0x19a7   :  { %2738 = vrcp.f32 %v1433_v10 }
0x19b1   :  { %v2739_v13 = vpop.eup %2738 }
0x19b2   :  { %v1437_v59 = vmul.f32 %v2739_v13, %v1347_v54 }
0x1a15   :  { %v1440_v61 = vpop.permute.xlu0 %1439 }
0x1a16   :  { %v1442_v11 = vmul.f32 %v2739_v13, %v1440_v61 }
0x1a18   :  { %1444 = vrot.lane.b32.xlu1 %v1442_v11, %s2790_s3 }
0x1a8a   :  { %v1445_v14 = vpop.permute.xlu1 %1444 }
0x1a8b   :  { %v1447_v38 = vadd.f32 %v1445_v14, %v1437_v59 }
0x1a8d   :  { %2740 = vtanh.f32 %v1447_v38 }
0x1a97   :  { %v2741_v15 = vpop.eup %2740 }
0x1a98   :  { %1450 = vrot.lane.b32.xlu0 %v2741_v15, %s2789_s14 }
0x1b0a   :  { %v1451_v16 = vpop.permute.xlu0 %1450 }
0x1b0b   :  { %v1453_v17 = vmul.f32 %v2739_v13, %v1451_v16 }
0x1b0d   :  { %1455 = vrot.lane.b32.xlu1 %v1453_v17, %s2790_s3 }
0x1b7f   :  { %v1456_v18 = vpop.permute.xlu1 %1455 }
0x1b80   :  { %2468 = vmatmul.mubr.msk.f32.vlgmr.msra.gmra.mrb[14].mxu1 %vm189_vm2, %v1456_v18 }
0x1b81   :  { %2624 = vmatpush3.bf16.msra.mxu1 %v3055_v52  ;;  %2489 = vmatprep.mubr.msk.f32.mxu1 %vm2787_vm1, %v2788_v4 }
0x1b82   :  { %2625 = vmatprep.subr.bf16.mxu1 %v2786_v0 }
0x1b85   :  { %2627 = vmatpush3.bf16.msra.mxu1 %v3065_v55 }
0x1b86   :  { %2634 = vmatprep.subr.bf16.mxu1 %v2786_v0 }
0x1c53   :  { %v1525_v20 = vpop.f32.mrb[14].mxu1 }
0x1c54   :  { %v1529_v21 = vadd.f32 %v1525_v20, %v1136_v19  ;;  %v2469_v22 = vpop.f32.mrb[15].mxu1 }
0x1c56   :  { %2742 = vtanh.f32 %v1529_v21  ;;  %v2179_v24 = vmul.f32 -1.442695, %v1529_v21 }
0x1c58   :  { %2744 = vpow2.f32 %v2179_v24 }
0x1c60   :  { %v2743_v23 = vpop.eup %2742 }
0x1c61   :  { %1539 = vrot.lane.b32.xlu0 %v2743_v23, %s2789_s14 }
0x1c62   :  { %v2745_v25 = vpop.eup %2744 }
0x1c63   :  { %v1533_v26 = vadd.f32 1.0, %v2745_v25 }
0x1c65   :  { %2746 = vrcp.f32 %v1533_v26 }
0x1c6f   :  { %v2747_v27 = vpop.eup %2746 }
0x1c70   :  { %v1537_v30 = vmul.f32 %v2747_v27, %v1447_v38  ;;  %v1151_v38 = vadd.f32 %v3091_v8, %v3120_v58 }
0x1cd3   :  { %v1540_v28 = vpop.permute.xlu0 %1539 }
0x1cd4   :  { %v1542_v29 = vmul.f32 %v2747_v27, %v1540_v28 }
0x1cd6   :  { %1544 = vrot.lane.b32.xlu1 %v1542_v29, %s2790_s3 }
0x1d48   :  { %v1545_v31 = vpop.permute.xlu1 %1544 }
0x1d49   :  { %v1547_v36 = vadd.f32 %v1545_v31, %v1537_v30  ;;  %v1156_v31 = vadd.f32 %v3118_v56, %v3091_v8  ;;  %v1954_v56 = vld [vmem:[%s3234_s7] sm:$0xff] }
0x1d4b   :  { %2748 = vtanh.f32 %v1547_v36 }
0x1d55   :  { %v2749_v32 = vpop.eup %2748 }
0x1d56   :  { %1550 = vrot.lane.b32.xlu0 %v2749_v32, %s2789_s14 }
0x1dc8   :  { %v1551_v33 = vpop.permute.xlu0 %1550 }
0x1dc9   :  { %v1553_v35 = vmul.f32 %v2747_v27, %v1551_v33 }
0x1dcb   :  { %1555 = vrot.lane.b32.xlu1 %v1553_v35, %s2790_s3 }
0x1e3d   :  { %v1556_v37 = vpop.permute.xlu1 %1555 }
0x1e3e   :  { %2479 = vmatmul.mubr.msk.f32.vlgmr.msra.gmra.mrb[24].mxu0 %vm189_vm2, %v1556_v37 }
0x1e3f   :  { %2630 = vmatpush3.bf16.msra.mxu0 %v3055_v52  ;;  %2500 = vmatprep.mubr.msk.f32.mxu0 %vm2787_vm1, %v2788_v4 }
0x1e40   :  { %2631 = vmatprep.subr.bf16.mxu0 %v2786_v0 }
0x1e43   :  { %2633 = vmatpush3.bf16.msra.mxu0 %v3065_v55 }
0x1e44   :  { %2640 = vmatprep.subr.bf16.mxu0 %v2786_v0 }
0x1f11   :  { %v1625_v62 = vpop.f32.mrb[24].mxu0 }
0x1f12   :  { %v1629_v42 = vadd.f32 %v1625_v62, %v1141_v41  ;;  %v2480_v43 = vpop.f32.mrb[25].mxu0 }
0x1f14   :  { %2750 = vtanh.f32 %v1629_v42  ;;  %v2181_v45 = vmul.f32 -1.442695, %v1629_v42 }
0x1f16   :  { %2752 = vpow2.f32 %v2181_v45 }
0x1f1e   :  { %v2751_v44 = vpop.eup %2750 }
0x1f1f   :  { %1639 = vrot.lane.b32.xlu0 %v2751_v44, %s2789_s14 }
0x1f20   :  { %v2753_v46 = vpop.eup %2752 }
0x1f21   :  { %v1633_v47 = vadd.f32 1.0, %v2753_v46  ;;  %v1955_v46 = vld [vmem:[%s3234_s7 + $0x8] sm:$0xff] }
0x1f23   :  { %2754 = vrcp.f32 %v1633_v47  ;;  %v1956_v47 = vld [vmem:[%s3234_s7 + $0x10] sm:$0xff] }
0x1f2d   :  { %v2755_v34 = vpop.eup %2754 }
0x1f2e   :  { %v1637_v50 = vmul.f32 %v2755_v34, %v1547_v36 }
0x1f91   :  { %v1640_v48 = vpop.permute.xlu0 %1639 }
0x1f92   :  { %v1642_v49 = vmul.f32 %v2755_v34, %v1640_v48  ;;  %v1957_v48 = vld [vmem:[%s3234_s7 + $0x18] sm:$0xff] }
0x1f94   :  { %1644 = vrot.lane.b32.xlu1 %v1642_v49, %s2790_s3  ;;  %v2644_v49 = vpack.c.bf16 %v1957_v48, %v1956_v47 }
0x2006   :  { %v1645_v51 = vpop.permute.xlu1 %1644 }
0x2007   :  { %v1647_v40 = vadd.f32 %v1645_v51, %v1637_v50 }
0x2009   :  { %2756 = vtanh.f32 %v1647_v40 }
0x2013   :  { %v2757_v53 = vpop.eup %2756 }
0x2014   :  { %1650 = vrot.lane.b32.xlu0 %v2757_v53, %s2789_s14 }
0x2086   :  { %v1651_v54 = vpop.permute.xlu0 %1650 }
0x2087   :  { %v1653_v57 = vmul.f32 %v2755_v34, %v1651_v54  ;;  %v2641_v34 = vpack.c.bf16 %v1955_v46, %v1954_v56  ;;  %v2041_v54 = vld [vmem:[%s3235_s9] sm:$0xff] }
0x2089   :  { %1655 = vrot.lane.b32.xlu1 %v1653_v57, %s2790_s3  ;;  %v2042_v57 = vld [vmem:[%s3235_s9 + $0x8] sm:$0xff] }
0x20fb   :  { %v1656_v60 = vpop.permute.xlu1 %1655 }
0x20fc   :  { %2490 = vmatmul.mubr.msk.f32.vlgmr.msra.gmra.mrb[16].mxu1 %vm189_vm2, %v1656_v60  ;;  %v2188_v60 = vld [vmem:[%s3236_s8] ss:$0 sm:$0xff] }
0x20fd   :  { %2636 = vmatpush3.bf16.msra.mxu1 %v3055_v52  ;;  %2511 = vmatprep.mubr.msk.f32.mxu1 %vm2787_vm1, %v2788_v4 }
0x20fe   :  { %2637 = vmatprep.subr.bf16.mxu1 %v2786_v0 }
0x2101   :  { %2639 = vmatpush3.bf16.msra.mxu1 %v3065_v55 }
0x2102   :  { %2646 = vmatprep.subr.bf16.mxu1 %v2786_v0 }
0x21cf   :  { %v1725_v1 = vpop.f32.mrb[16].mxu1 }
0x21d0   :  { %v1729_v2 = vadd.f32 %v1725_v1, %v1146_v63  ;;  %v2491_v3 = vpop.f32.mrb[17].mxu1 }
0x21d2   :  { %2758 = vtanh.f32 %v1729_v2  ;;  %v2183_v52 = vmul.f32 -1.442695, %v1729_v2 }
0x21d4   :  { %2760 = vpow2.f32 %v2183_v52 }
0x21dc   :  { %v2759_v5 = vpop.eup %2758 }
0x21dd   :  { %1739 = vrot.lane.b32.xlu0 %v2759_v5, %s2789_s14  ;;  %v2190_v5 = vld [vmem:[%s3237_s10] ss:$0 sm:$0xff] }
0x21de   :  { %v2761_v6 = vpop.eup %2760 }
0x21df   :  { %v1733_v7 = vadd.f32 1.0, %v2761_v6 }
0x21e1   :  { %2762 = vrcp.f32 %v1733_v7 }
0x21eb   :  { %v2763_v9 = vpop.eup %2762 }
0x21ec   :  { %v1737_v10 = vmul.f32 %v2763_v9, %v1647_v40 }
0x224f   :  { %v1740_v12 = vpop.permute.xlu0 %1739 }
0x2250   :  { %v1742_v55 = vmul.f32 %v2763_v9, %v1740_v12 }
0x2252   :  { %1744 = vrot.lane.b32.xlu1 %v1742_v55, %s2790_s3 }
0x22c4   :  { %v1745_v13 = vpop.permute.xlu1 %1744 }
0x22c5   :  { %v1747_v39 = vadd.f32 %v1745_v13, %v1737_v10 }
0x22c7   :  { %2764 = vtanh.f32 %v1747_v39 }
0x22d1   :  { %v2765_v61 = vpop.eup %2764 }
0x22d2   :  { %1750 = vrot.lane.b32.xlu0 %v2765_v61, %s2789_s14 }
0x2344   :  { %v1751_v11 = vpop.permute.xlu0 %1750 }
0x2345   :  { %v1753_v59 = vmul.f32 %v2763_v9, %v1751_v11 }
0x2347   :  { %1755 = vrot.lane.b32.xlu1 %v1753_v59, %s2790_s3 }
0x23b9   :  { %v1756_v14 = vpop.permute.xlu1 %1755 }
0x23ba   :  { %2501 = vmatmul.mubr.msk.f32.vlgmr.msra.gmra.mrb[26].mxu0 %vm189_vm2, %v1756_v14 }
0x23bb   :  { %2522 = vmatprep.mubr.msk.f32.mxu0 %vm2787_vm1, %v2788_v4  ;;  %2642 = vmatpush3.bf16.msra.mxu0 %v2641_v34 }
0x23bc   :  { %2643 = vmatprep.subr.bf16.mxu0 %v2786_v0  ;;  %v2647_v0 = vpack.c.bf16 %v2042_v57, %v2041_v54 }
0x23bf   :  { %2645 = vmatpush3.bf16.msra.mxu0 %v2644_v49 }
0x248d   :  { %v1825_v15 = vpop.f32.mrb[26].mxu0 }
0x248e   :  { %v1829_v16 = vadd.f32 %v1825_v15, %v1151_v38  ;;  %v2502_v17 = vpop.f32.mrb[27].mxu0 }
0x2490   :  { %2766 = vtanh.f32 %v1829_v16  ;;  %v2185_v19 = vmul.f32 -1.442695, %v1829_v16 }
0x2492   :  { %2768 = vpow2.f32 %v2185_v19 }
0x249a   :  { %v2767_v18 = vpop.eup %2766 }
0x249b   :  { %1839 = vrot.lane.b32.xlu0 %v2767_v18, %s2789_s14 }
0x249c   :  { %v2769_v20 = vpop.eup %2768 }
0x249d   :  { %v1833_v21 = vadd.f32 1.0, %v2769_v20 }
0x249f   :  { %2770 = vrcp.f32 %v1833_v21 }
0x24a9   :  { %v2771_v22 = vpop.eup %2770 }
0x24aa   :  { %v1837_v25 = vmul.f32 %v2771_v22, %v1747_v39 }
0x250d   :  { %v1840_v23 = vpop.permute.xlu0 %1839 }
0x250e   :  { %v1842_v24 = vmul.f32 %v2771_v22, %v1840_v23 }
0x2510   :  { %1844 = vrot.lane.b32.xlu1 %v1842_v24, %s2790_s3 }
0x2582   :  { %v1845_v26 = vpop.permute.xlu1 %1844 }
0x2583   :  { %v1847_v58 = vadd.f32 %v1845_v26, %v1837_v25 }
0x2585   :  { %2772 = vtanh.f32 %v1847_v58 }
0x258f   :  { %v2773_v27 = vpop.eup %2772 }
0x2590   :  { %1850 = vrot.lane.b32.xlu0 %v2773_v27, %s2789_s14 }
0x2602   :  { %v1851_v28 = vpop.permute.xlu0 %1850 }
0x2603   :  { %v1853_v29 = vmul.f32 %v2771_v22, %v1851_v28 }
0x2605   :  { %1855 = vrot.lane.b32.xlu1 %v1853_v29, %s2790_s3 }
0x2677   :  { %v1856_v30 = vpop.permute.xlu1 %1855 }
0x2678   :  { %2512 = vmatmul.mubr.msk.f32.vlgmr.msra.gmra.mrb[18].mxu1 %vm189_vm2, %v1856_v30 }
0x2679   :  { %2529 = vmatprep.mubr.msk.f32.mxu1 %vm2787_vm1, %v2788_v4  ;;  %2648 = vmatpush3.bf16.msra.mxu1 %v2647_v0 }
0x274b   :  { %v1925_v36 = vpop.f32.mrb[18].mxu1 }
0x274c   :  { %v1929_v32 = vadd.f32 %v1925_v36, %v1156_v31  ;;  %v2513_v33 = vpop.f32.mrb[19].mxu1 }
0x274e   :  { %2774 = vtanh.f32 %v1929_v32  ;;  %v2187_v37 = vmul.f32 -1.442695, %v1929_v32 }
0x2750   :  { %2776 = vpow2.f32 %v2187_v37 }
0x2758   :  { %v2775_v35 = vpop.eup %2774 }
0x2759   :  { %1939 = vrot.lane.b32.xlu0 %v2775_v35, %s2789_s14 }
0x275a   :  { %v2777_v41 = vpop.eup %2776 }
0x275b   :  { %v1933_v62 = vadd.f32 1.0, %v2777_v41 }
0x275d   :  { %2778 = vrcp.f32 %v1933_v62 }
0x2767   :  { %v2779_v42 = vpop.eup %2778 }
0x2768   :  { %v1937_v4 = vmul.f32 %v2779_v42, %v1847_v58 }
0x27cb   :  { %v1940_v43 = vpop.permute.xlu0 %1939 }
0x27cc   :  { %v1942_v44 = vmul.f32 %v2779_v42, %v1940_v43 }
0x27ce   :  { %1944 = vrot.lane.b32.xlu1 %v1942_v44, %s2790_s3 }
0x2840   :  { %v1945_v45 = vpop.permute.xlu1 %1944 }
0x2841   :  { %v1947_v8 = vadd.f32 %v1945_v45, %v1937_v4 }
0x2843   :  { %2780 = vtanh.f32 %v1947_v8 }
0x284d   :  { %v2781_v50 = vpop.eup %2780 }
0x284e   :  { %1950 = vrot.lane.b32.xlu0 %v2781_v50, %s2789_s14 }
0x28c0   :  { %v1951_v51 = vpop.permute.xlu0 %1950 }
0x28c1   :  { %v1953_v40 = vmul.f32 %v2779_v42, %v1951_v51 }
0x28c3   :  { %1966 = vrot.lane.b32.xlu1 %v1953_v40, %s2790_s3 }
0x2935   :  { %v1967_v53 = vpop.permute.xlu1 %1966 }
0x2936   :  { %2523 = vmatmul.mubr.msk.f32.vlgmr.msra.gmra.mrb[28].mxu0 %vm189_vm2, %v1967_v53 }
0x2a09   :  { %v2036_v63 = vpop.f32.mrb[28].mxu0 }
0x2a0a   :  { %v2037_v1 = vadd.f32 %v2188_v60, %v2036_v63  ;;  %v2524_v2 = vpop.f32.mrb[29].mxu0 }
0x2a0c   :  { %v2040_v3 = vmax.f32 %v2037_v1, 0.0 }
0x2a0e   :  { %2530 = vmatmul.mubr.msk.f32.vlgmr.msra.gmra.mrb[20].mxu1 %vm59_vm0, %v2040_v3 }
0x2ae1   :  { %v2119_v52 = vpop.f32.mrb[20].mxu1 }
0x2ae2   :  { %v2120_v6 = vadd.f32 %v2190_v5, %v2119_v52  ;;  %v2531_v7 = vpop.f32.mrb[21].mxu1 }
0x2ae4   :  { %v2124_v9 = vsel %vm2123_vm3, %v2120_v6, -inf }
0x2ae5   :  { %2125 = vmax.xlane.f32.xlu0 %v2124_v9 }
0x2b72   :  { %v2126_v12 = vpop.xlane.xlu0 %2125 }
0x2b73   :  { %v2127_v55 = vsub.f32 %v2120_v6, %v2126_v12 }
0x2b75   :  { %v2128_v10 = vmul.f32 1.442695, %v2127_v55 }
0x2b77   :  { %2782 = vpow2.f32 %v2128_v10 }
0x2b81   :  { %v2783_v13 = vpop.eup %2782 }
0x2b82   :  { %v2130_v39 = vsel %vm2123_vm3, %v2783_v13, 0.0 }
0x2b83   :  { %2131 = vadd.xlane.f32.xlu1 %v2130_v39 }
0x2c10   :  { %v2132_v61 = vpop.xlane.xlu1 %2131 }
0x2c11   :  { %2784 = vrcp.f32 %v2132_v61 }
0x2c1b   :  { %v2785_v11 = vpop.eup %2784 }
0x2c1c   :  { %v2134_v59 = vmul.f32 %v2785_v11, %v2783_v13 }
0x2c1e   :  { %2135 = vst.msk [vmem:[%s3238_s11] sm:$0xff] %vm2123_vm3, %v2134_v59 }

</bundles_post_ra>
